<compile_context>
chip_gen: v5e
topology: v5e:2x2
jax: 0.10.0
libtpu: 0.0.40
codegen_flags: <defaults>
</compile_context>

<pallas_src>
import math
import jax
import jax.numpy as jnp
from jax import lax
from jax.experimental import pallas as pl
from jax.experimental.pallas import tpu as pltpu

B, N, E, H = 2, 8, 32, 4           # batch, graph_size, embed_dim, n_heads
KD = E // H                        # key_dim
VD = KD                            # val_dim
R = B * N                          # rows per head block (16)
HR = H * R                         # head-stacked rows (64)
HE = H * E                         # head-stacked contraction dim (128)
NORM = 1.0 / math.sqrt(KD)
BN_EPS = 1e-5

# Fused projection column layout (W_big is (HE, NC)):
#   [0:E)                       skip columns: x @ sum_i Wlin_i^T   (head-0 rows only)
#   [E + i*E : E + (i+1)*E)     branch-i V·Wo·Wlin^T columns (32 wide, 32-aligned)
#   [4E + 2*KD*i : +KD)         branch-i Q columns (1/sqrt(kd) folded in)
#   [4E + 2*KD*i + KD : +KD)    branch-i K columns
C_VW = E
C_QK = 4 * E
NC = 4 * E + 6 * KD                # 176


# ----------------------------- Pallas kernel --------------------------------
def mgt_kernel(xbd_ref, masks_ref, wbig_ref, wff_ref, vec_ref, out_ref):
    xb = xbd_ref[...].astype(jnp.bfloat16)                      # (64, 128)

    # ONE fused projection: all 3 branches' head-stacked Q, K, V·Wo·Wlin^T
    # plus the skip term x @ sum_i Wlin_i^T.
    proj = jnp.dot(xb, wbig_ref[...],
                   preferred_element_type=jnp.float32)          # (64, 176) f32
    projb = proj.astype(jnp.bfloat16)                           # one cast

    skip = proj[0:R, 0:E]                                       # (16, 32) f32

    # acc accumulates sum_i attn_i @ (V_i · Wo_i · Wlin_i^T), head-stacked rows.
    acc = jnp.zeros((HR, E), jnp.float32)
    for i in range(3):                                          # three branches
        vw = projb[:, C_VW + i * E: C_VW + (i + 1) * E]         # (64, 32)
        qo = C_QK + 2 * KD * i
        q = projb[:, qo: qo + KD]                               # (64, 8)
        k = projb[:, qo + KD: qo + 2 * KD]                      # (64, 8)

        # Q @ K^T over all heads/batches at once; off-block entries are killed
        # by the block-diagonal additive mask, so one softmax chain per branch.
        compat = lax.dot_general(q, k, (((1,), (1,)), ((), ())),
                                 preferred_element_type=jnp.float32)  # (64, 64)
        compat = compat + masks_ref[i]
        m = jnp.maximum(jnp.max(compat, axis=-1, keepdims=True), -1e30)
        p = jnp.exp(compat - m)
        s = jnp.maximum(jnp.sum(p, axis=-1, keepdims=True), 1e-30)
        attn = (p * pl.reciprocal(s, approx=True)).astype(jnp.bfloat16)
        acc = acc + jnp.dot(attn, vw, preferred_element_type=jnp.float32)

    # Collapse head blocks (sublane-aligned slices, pure vreg adds).
    contrib = acc[0:R] + acc[R:2 * R] + acc[2 * R:3 * R] + acc[3 * R:4 * R]

    vec = vec_ref[...]                                          # (6, 32) f32
    hh = jnp.maximum(skip + contrib + vec[0], 0.0)              # Linear(3E,E)+ReLU
    hh = hh * vec[1] + vec[2]                                   # BatchNorm1d #1 (eval)
    ff = jnp.maximum(jnp.dot(hh.astype(jnp.bfloat16), wff_ref[...],
                             preferred_element_type=jnp.float32) + vec[3], 0.0)
    hh = hh + ff                                                # position-wise FF skip
    hh = hh * vec[4] + vec[5]                                   # BatchNorm1d #2 (eval)
    out_ref[...] = hh


# ----------------------------- wrapper ---------------------------------------
def mgt_forward(x_bd, masks, wbig, wff, vecs):
    vm = pltpu.MemorySpace.VMEM
    out = pl.pallas_call(
        mgt_kernel,
        out_shape=jax.ShapeDtypeStruct((R, E), jnp.float32),
        in_specs=[pl.BlockSpec(memory_space=vm)] * 5,
        out_specs=pl.BlockSpec(memory_space=vm),
    )(x_bd, masks, wbig, wff, vecs)
    return out.reshape(B, N, E)


# ------------------------ host-side layout plumbing --------------------------
def pack_weights(p):
    """Fold Wo·Wlin and the skip term into one (HE, NC) projection matrix."""
    WlinT = [p['Wlin'][:, i * E:(i + 1) * E].T for i in range(3)]   # (E, E) each
    wbig = jnp.zeros((HE, NC), jnp.float32)
    wbig = wbig.at[0:E, 0:E].set(WlinT[0] + WlinT[1] + WlinT[2])    # skip (head-0 rows)
    for i in range(3):
        Wq, Wk = p[f'Wq{i + 1}'], p[f'Wk{i + 1}']                   # (H, E, KD)
        Wv, Wo = p[f'Wv{i + 1}'], p[f'Wo{i + 1}']                   # (H, E, VD), (H, KD, E)
        vw = jnp.einsum('hek,hkf,fg->heg', Wv, Wo, WlinT[i])        # Wv[h]@Wo[h]@Wlin_i^T
        wbig = wbig.at[:, C_VW + i * E: C_VW + (i + 1) * E].set(vw.reshape(HE, E))
        qo = C_QK + 2 * KD * i
        wbig = wbig.at[:, qo:qo + KD].set(NORM * Wq.reshape(HE, KD))  # 1/sqrt(kd) folded
        wbig = wbig.at[:, qo + KD:qo + 2 * KD].set(Wk.reshape(HE, KD))
    wbig = wbig.astype(jnp.bfloat16)
    wff = p['Wff'].T.astype(jnp.bfloat16)
    s = 1.0 / math.sqrt(1.0 + BN_EPS)                               # BN eval scale
    vecs = jnp.stack([p['blin'], p['g1'] * s, p['b1'],
                      p['bff'], p['g2'] * s, p['b2']]).astype(jnp.float32)
    return wbig, wff, vecs


def prepare_inputs(x, m1, m2, m3):
    """Head-stacked block-diagonal input & (head, batch) block-diagonal masks."""
    x2d = x.reshape(R, E)
    x_bd = jnp.zeros((HR, HE), jnp.float32)
    for h in range(H):
        x_bd = x_bd.at[h * R:(h + 1) * R, h * E:(h + 1) * E].set(x2d)

    def stack_mask(mask):                    # (B,N,N) additive -> (HR, HR)
        big = jnp.full((HR, HR), -jnp.inf, jnp.float32)
        for h in range(H):
            for b in range(B):
                o = h * R + b * N
                big = big.at[o:o + N, o:o + N].set(mask[b])
        return big

    masks = jnp.stack([stack_mask(m1), stack_mask(m2), stack_mask(m3)])
    return x_bd, masks


# ------------------------- pure-JAX reference --------------------------------
def mha_ref(x, mask, Wq, Wk, Wv, Wo):
    Q = jnp.einsum('bne,hek->hbnk', x, Wq)
    K = jnp.einsum('bne,hek->hbnk', x, Wk)
    V = jnp.einsum('bne,hev->hbnv', x, Wv)
    compat = NORM * jnp.einsum('hbqk,hbnk->hbqn', Q, K) + mask[None]
    attn = jax.nn.softmax(compat, axis=-1)
    heads = jnp.einsum('hbqn,hbnv->hbqv', attn, V)            # (H,B,N,VD)
    hcat = jnp.transpose(heads, (1, 2, 0, 3)).reshape(B * N, H * VD)
    return (hcat @ Wo.reshape(H * KD, E)).reshape(B, N, E)


def mgt_ref(x, m1, m2, m3, p):
    h1 = x + mha_ref(x, m1, p['Wq1'], p['Wk1'], p['Wv1'], p['Wo1'])
    h2 = x + mha_ref(x, m2, p['Wq2'], p['Wk2'], p['Wv2'], p['Wo2'])
    h3 = x + mha_ref(x, m3, p['Wq3'], p['Wk3'], p['Wv3'], p['Wo3'])
    hh = jnp.concatenate([h1, h2, h3], axis=-1)
    hh = jnp.maximum(jnp.einsum('bnc,ec->bne', hh, p['Wlin']) + p['blin'], 0.0)
    s = 1.0 / jnp.sqrt(1.0 + BN_EPS)
    hh = hh * (p['g1'] * s) + p['b1']
    hh = hh + jnp.maximum(jnp.einsum('bne,fe->bnf', hh, p['Wff']) + p['bff'], 0.0)
    hh = hh * (p['g2'] * s) + p['b2']
    return hh


# ----------------------------- main -------------------------------------------
if __name__ == "__main__":
    key = jax.random.PRNGKey(0)
    keys = iter(jax.random.split(key, 64))

    def uni(shape, stdv):
        return jax.random.uniform(next(keys), shape, jnp.float32, -stdv, stdv)

    p = {}
    for i in (1, 2, 3):  # three MultiHeadAttention modules (input_dim=embed_dim=E)
        p[f'Wq{i}'] = uni((H, E, KD), 1.0 / math.sqrt(KD))
        p[f'Wk{i}'] = uni((H, E, KD), 1.0 / math.sqrt(KD))
        p[f'Wv{i}'] = uni((H, E, VD), 1.0 / math.sqrt(VD))
        p[f'Wo{i}'] = uni((H, KD, E), 1.0 / math.sqrt(E))
    p['Wlin'] = uni((E, 3 * E), 1.0 / math.sqrt(3 * E))   # nn.Linear(3E, E).weight
    p['blin'] = uni((E,), 1.0 / math.sqrt(3 * E))
    p['g1'] = uni((E,), 1.0 / math.sqrt(E))               # BatchNorm1d affine
    p['b1'] = uni((E,), 1.0 / math.sqrt(E))
    p['Wff'] = uni((E, E), 1.0 / math.sqrt(E))            # nn.Linear(E, E).weight
    p['bff'] = uni((E,), 1.0 / math.sqrt(E))
    p['g2'] = uni((E,), 1.0 / math.sqrt(E))
    p['b2'] = uni((E,), 1.0 / math.sqrt(E))

    # ---- inputs ----
    x = jax.random.normal(next(keys), (B, N, E), jnp.float32)

    def make_mask(k):
        allow = jnp.logical_or(jax.random.bernoulli(k, 0.6, (B, N, N)),
                               jnp.eye(N, dtype=bool)[None])
        return jnp.where(allow, 0.0, -jnp.inf).astype(jnp.float32)

    m1 = make_mask(next(keys))
    m2 = make_mask(next(keys))
    m3 = make_mask(next(keys))

    # ---- pack & run ----
    wbig, wff, vecs = pack_weights(p)
    x_bd, masks = prepare_inputs(x, m1, m2, m3)
    out = mgt_forward(x_bd, masks, wbig, wff, vecs)
    out = jax.block_until_ready(out)

    ref = mgt_ref(x, m1, m2, m3, p)
    assert out.shape == (B, N, E)
    assert bool(jnp.all(jnp.isfinite(out)))
    err = float(jnp.max(jnp.abs(out - ref)))
    assert err < 5e-2, f"mismatch vs JAX reference: {err}"

    print("KERNEL_OK")
</pallas_src>

<mosaic_0001>
module attributes {stable_mosaic.version = 11 : i64} {
  func.func @mgt_kernel(%arg0: memref<64x128xf32, #tpu.memory_space<vmem>>, %arg1: memref<3x64x64xf32, #tpu.memory_space<vmem>>, %arg2: memref<128x176xbf16, #tpu.memory_space<vmem>>, %arg3: memref<32x32xbf16, #tpu.memory_space<vmem>>, %arg4: memref<6x32xf32, #tpu.memory_space<vmem>>, %arg5: memref<16x32xf32, #tpu.memory_space<vmem>>) attributes {dimension_semantics = [], scalar_prefetch = 0 : i64, scratch_operands = 0 : i64, tpu.core_type = #tpu.core_type<tc>} {
    %c0 = arith.constant 0 : index
    %c0_0 = arith.constant 0 : index
    %0 = vector.load %arg0[%c0, %c0_0] : memref<64x128xf32, #tpu.memory_space<vmem>>, vector<64x128xf32>
    %1 = arith.truncf %0 : vector<64x128xf32> to vector<64x128xbf16>
    %c0_1 = arith.constant 0 : index
    %c0_2 = arith.constant 0 : index
    %2 = vector.load %arg2[%c0_1, %c0_2] : memref<128x176xbf16, #tpu.memory_space<vmem>>, vector<128x176xbf16>
    %cst = arith.constant dense<0.000000e+00> : vector<64x176xf32>
    %3 = tpu.matmul %1, %2, %cst {dimension_numbers = #tpu.dot_dimension_numbers<[1], [0], [0], [1], [0, 0, 1, 1], [], []>} : vector<64x128xbf16>, vector<128x176xbf16>, vector<64x176xf32> -> vector<64x176xf32>
    %4 = arith.truncf %3 : vector<64x176xf32> to vector<64x176xbf16>
    %5 = vector.extract_strided_slice %3 {offsets = [0, 0], sizes = [16, 32], strides = [1, 1]} : vector<64x176xf32> to vector<16x32xf32>
    %cst_3 = arith.constant 0.000000e+00 : f32
    %6 = vector.broadcast %cst_3 : f32 to vector<64x32xf32>
    %7 = vector.extract_strided_slice %4 {offsets = [0, 32], sizes = [64, 32], strides = [1, 1]} : vector<64x176xbf16> to vector<64x32xbf16>
    %8 = vector.extract_strided_slice %4 {offsets = [0, 128], sizes = [64, 8], strides = [1, 1]} : vector<64x176xbf16> to vector<64x8xbf16>
    %9 = vector.extract_strided_slice %4 {offsets = [0, 136], sizes = [64, 8], strides = [1, 1]} : vector<64x176xbf16> to vector<64x8xbf16>
    %cst_4 = arith.constant dense<0.000000e+00> : vector<64x64xf32>
    %10 = tpu.matmul %8, %9, %cst_4 {dimension_numbers = #tpu.dot_dimension_numbers<[1], [1], [0], [0], [0, 0, 1, 0], [], []>} : vector<64x8xbf16>, vector<64x8xbf16>, vector<64x64xf32> -> vector<64x64xf32>
    %c0_5 = arith.constant 0 : index
    %c0_6 = arith.constant 0 : index
    %c0_7 = arith.constant 0 : index
    %11 = vector.load %arg1[%c0_5, %c0_6, %c0_7] : memref<3x64x64xf32, #tpu.memory_space<vmem>>, vector<1x64x64xf32>
    %12 = vector.shape_cast %11 : vector<1x64x64xf32> to vector<64x64xf32>
    %13 = arith.addf %10, %12 : vector<64x64xf32>
    %cst_8 = arith.constant dense<0xFF800000> : vector<64xf32>
    %14 = vector.multi_reduction <maximumf>, %13, %cst_8 [1] : vector<64x64xf32> to vector<64xf32>
    %15 = vector.shape_cast %14 : vector<64xf32> to vector<64x1xf32>
    %cst_9 = arith.constant -1.000000e+30 : f32
    %16 = vector.broadcast %cst_9 : f32 to vector<64x1xf32>
    %17 = arith.maximumf %15, %16 : vector<64x1xf32>
    %18 = vector.broadcast %17 : vector<64x1xf32> to vector<64x64xf32>
    %19 = arith.subf %13, %18 : vector<64x64xf32>
    %20 = math.exp %19 : vector<64x64xf32>
    %cst_10 = arith.constant dense<0.000000e+00> : vector<64xf32>
    %21 = vector.multi_reduction <add>, %20, %cst_10 [1] : vector<64x64xf32> to vector<64xf32>
    %22 = vector.shape_cast %21 : vector<64xf32> to vector<64x1xf32>
    %cst_11 = arith.constant 1.000000e-30 : f32
    %23 = vector.broadcast %cst_11 : f32 to vector<64x1xf32>
    %24 = arith.maximumf %22, %23 : vector<64x1xf32>
    %25 = tpu.reciprocal %24 {approx = true} : vector<64x1xf32> -> vector<64x1xf32>
    %26 = vector.broadcast %25 : vector<64x1xf32> to vector<64x64xf32>
    %27 = arith.mulf %20, %26 : vector<64x64xf32>
    %28 = arith.truncf %27 : vector<64x64xf32> to vector<64x64xbf16>
    %cst_12 = arith.constant dense<0.000000e+00> : vector<64x32xf32>
    %29 = tpu.matmul %28, %7, %cst_12 {dimension_numbers = #tpu.dot_dimension_numbers<[1], [0], [0], [1], [0, 0, 1, 1], [], []>} : vector<64x64xbf16>, vector<64x32xbf16>, vector<64x32xf32> -> vector<64x32xf32>
    %30 = arith.addf %6, %29 : vector<64x32xf32>
    %31 = vector.extract_strided_slice %4 {offsets = [0, 64], sizes = [64, 32], strides = [1, 1]} : vector<64x176xbf16> to vector<64x32xbf16>
    %32 = vector.extract_strided_slice %4 {offsets = [0, 144], sizes = [64, 8], strides = [1, 1]} : vector<64x176xbf16> to vector<64x8xbf16>
    %33 = vector.extract_strided_slice %4 {offsets = [0, 152], sizes = [64, 8], strides = [1, 1]} : vector<64x176xbf16> to vector<64x8xbf16>
    %cst_13 = arith.constant dense<0.000000e+00> : vector<64x64xf32>
    %34 = tpu.matmul %32, %33, %cst_13 {dimension_numbers = #tpu.dot_dimension_numbers<[1], [1], [0], [0], [0, 0, 1, 0], [], []>} : vector<64x8xbf16>, vector<64x8xbf16>, vector<64x64xf32> -> vector<64x64xf32>
    %c1 = arith.constant 1 : index
    %c0_14 = arith.constant 0 : index
    %c0_15 = arith.constant 0 : index
    %35 = vector.load %arg1[%c1, %c0_14, %c0_15] : memref<3x64x64xf32, #tpu.memory_space<vmem>>, vector<1x64x64xf32>
    %36 = vector.shape_cast %35 : vector<1x64x64xf32> to vector<64x64xf32>
    %37 = arith.addf %34, %36 : vector<64x64xf32>
    %cst_16 = arith.constant dense<0xFF800000> : vector<64xf32>
    %38 = vector.multi_reduction <maximumf>, %37, %cst_16 [1] : vector<64x64xf32> to vector<64xf32>
    %39 = vector.shape_cast %38 : vector<64xf32> to vector<64x1xf32>
    %cst_17 = arith.constant -1.000000e+30 : f32
    %40 = vector.broadcast %cst_17 : f32 to vector<64x1xf32>
    %41 = arith.maximumf %39, %40 : vector<64x1xf32>
    %42 = vector.broadcast %41 : vector<64x1xf32> to vector<64x64xf32>
    %43 = arith.subf %37, %42 : vector<64x64xf32>
    %44 = math.exp %43 : vector<64x64xf32>
    %cst_18 = arith.constant dense<0.000000e+00> : vector<64xf32>
    %45 = vector.multi_reduction <add>, %44, %cst_18 [1] : vector<64x64xf32> to vector<64xf32>
    %46 = vector.shape_cast %45 : vector<64xf32> to vector<64x1xf32>
    %cst_19 = arith.constant 1.000000e-30 : f32
    %47 = vector.broadcast %cst_19 : f32 to vector<64x1xf32>
    %48 = arith.maximumf %46, %47 : vector<64x1xf32>
    %49 = tpu.reciprocal %48 {approx = true} : vector<64x1xf32> -> vector<64x1xf32>
    %50 = vector.broadcast %49 : vector<64x1xf32> to vector<64x64xf32>
    %51 = arith.mulf %44, %50 : vector<64x64xf32>
    %52 = arith.truncf %51 : vector<64x64xf32> to vector<64x64xbf16>
    %cst_20 = arith.constant dense<0.000000e+00> : vector<64x32xf32>
    %53 = tpu.matmul %52, %31, %cst_20 {dimension_numbers = #tpu.dot_dimension_numbers<[1], [0], [0], [1], [0, 0, 1, 1], [], []>} : vector<64x64xbf16>, vector<64x32xbf16>, vector<64x32xf32> -> vector<64x32xf32>
    %54 = arith.addf %30, %53 : vector<64x32xf32>
    %55 = vector.extract_strided_slice %4 {offsets = [0, 96], sizes = [64, 32], strides = [1, 1]} : vector<64x176xbf16> to vector<64x32xbf16>
    %56 = vector.extract_strided_slice %4 {offsets = [0, 160], sizes = [64, 8], strides = [1, 1]} : vector<64x176xbf16> to vector<64x8xbf16>
    %57 = vector.extract_strided_slice %4 {offsets = [0, 168], sizes = [64, 8], strides = [1, 1]} : vector<64x176xbf16> to vector<64x8xbf16>
    %cst_21 = arith.constant dense<0.000000e+00> : vector<64x64xf32>
    %58 = tpu.matmul %56, %57, %cst_21 {dimension_numbers = #tpu.dot_dimension_numbers<[1], [1], [0], [0], [0, 0, 1, 0], [], []>} : vector<64x8xbf16>, vector<64x8xbf16>, vector<64x64xf32> -> vector<64x64xf32>
    %c2 = arith.constant 2 : index
    %c0_22 = arith.constant 0 : index
    %c0_23 = arith.constant 0 : index
    %59 = vector.load %arg1[%c2, %c0_22, %c0_23] : memref<3x64x64xf32, #tpu.memory_space<vmem>>, vector<1x64x64xf32>
    %60 = vector.shape_cast %59 : vector<1x64x64xf32> to vector<64x64xf32>
    %61 = arith.addf %58, %60 : vector<64x64xf32>
    %cst_24 = arith.constant dense<0xFF800000> : vector<64xf32>
    %62 = vector.multi_reduction <maximumf>, %61, %cst_24 [1] : vector<64x64xf32> to vector<64xf32>
    %63 = vector.shape_cast %62 : vector<64xf32> to vector<64x1xf32>
    %cst_25 = arith.constant -1.000000e+30 : f32
    %64 = vector.broadcast %cst_25 : f32 to vector<64x1xf32>
    %65 = arith.maximumf %63, %64 : vector<64x1xf32>
    %66 = vector.broadcast %65 : vector<64x1xf32> to vector<64x64xf32>
    %67 = arith.subf %61, %66 : vector<64x64xf32>
    %68 = math.exp %67 : vector<64x64xf32>
    %cst_26 = arith.constant dense<0.000000e+00> : vector<64xf32>
    %69 = vector.multi_reduction <add>, %68, %cst_26 [1] : vector<64x64xf32> to vector<64xf32>
    %70 = vector.shape_cast %69 : vector<64xf32> to vector<64x1xf32>
    %cst_27 = arith.constant 1.000000e-30 : f32
    %71 = vector.broadcast %cst_27 : f32 to vector<64x1xf32>
    %72 = arith.maximumf %70, %71 : vector<64x1xf32>
    %73 = tpu.reciprocal %72 {approx = true} : vector<64x1xf32> -> vector<64x1xf32>
    %74 = vector.broadcast %73 : vector<64x1xf32> to vector<64x64xf32>
    %75 = arith.mulf %68, %74 : vector<64x64xf32>
    %76 = arith.truncf %75 : vector<64x64xf32> to vector<64x64xbf16>
    %cst_28 = arith.constant dense<0.000000e+00> : vector<64x32xf32>
    %77 = tpu.matmul %76, %55, %cst_28 {dimension_numbers = #tpu.dot_dimension_numbers<[1], [0], [0], [1], [0, 0, 1, 1], [], []>} : vector<64x64xbf16>, vector<64x32xbf16>, vector<64x32xf32> -> vector<64x32xf32>
    %78 = arith.addf %54, %77 : vector<64x32xf32>
    %79 = vector.extract_strided_slice %78 {offsets = [0, 0], sizes = [16, 32], strides = [1, 1]} : vector<64x32xf32> to vector<16x32xf32>
    %80 = vector.extract_strided_slice %78 {offsets = [16, 0], sizes = [16, 32], strides = [1, 1]} : vector<64x32xf32> to vector<16x32xf32>
    %81 = arith.addf %79, %80 : vector<16x32xf32>
    %82 = vector.extract_strided_slice %78 {offsets = [32, 0], sizes = [16, 32], strides = [1, 1]} : vector<64x32xf32> to vector<16x32xf32>
    %83 = arith.addf %81, %82 : vector<16x32xf32>
    %84 = vector.extract_strided_slice %78 {offsets = [48, 0], sizes = [16, 32], strides = [1, 1]} : vector<64x32xf32> to vector<16x32xf32>
    %85 = arith.addf %83, %84 : vector<16x32xf32>
    %c0_29 = arith.constant 0 : index
    %c0_30 = arith.constant 0 : index
    %86 = vector.load %arg4[%c0_29, %c0_30] : memref<6x32xf32, #tpu.memory_space<vmem>>, vector<6x32xf32>
    %87 = arith.addf %5, %85 : vector<16x32xf32>
    %88 = vector.extract_strided_slice %86 {offsets = [0, 0], sizes = [1, 32], strides = [1, 1]} : vector<6x32xf32> to vector<1x32xf32>
    %89 = vector.shape_cast %88 : vector<1x32xf32> to vector<32xf32>
    %90 = vector.shape_cast %89 : vector<32xf32> to vector<1x32xf32>
    %91 = vector.broadcast %90 : vector<1x32xf32> to vector<16x32xf32>
    %92 = arith.addf %87, %91 : vector<16x32xf32>
    %cst_31 = arith.constant 0.000000e+00 : f32
    %93 = vector.broadcast %cst_31 : f32 to vector<16x32xf32>
    %94 = arith.maximumf %92, %93 : vector<16x32xf32>
    %95 = vector.extract_strided_slice %86 {offsets = [1, 0], sizes = [1, 32], strides = [1, 1]} : vector<6x32xf32> to vector<1x32xf32>
    %96 = vector.shape_cast %95 : vector<1x32xf32> to vector<32xf32>
    %97 = vector.shape_cast %96 : vector<32xf32> to vector<1x32xf32>
    %98 = vector.broadcast %97 : vector<1x32xf32> to vector<16x32xf32>
    %99 = arith.mulf %94, %98 : vector<16x32xf32>
    %100 = vector.extract_strided_slice %86 {offsets = [2, 0], sizes = [1, 32], strides = [1, 1]} : vector<6x32xf32> to vector<1x32xf32>
    %101 = vector.shape_cast %100 : vector<1x32xf32> to vector<32xf32>
    %102 = vector.shape_cast %101 : vector<32xf32> to vector<1x32xf32>
    %103 = vector.broadcast %102 : vector<1x32xf32> to vector<16x32xf32>
    %104 = arith.addf %99, %103 : vector<16x32xf32>
    %105 = arith.truncf %104 : vector<16x32xf32> to vector<16x32xbf16>
    %c0_32 = arith.constant 0 : index
    %c0_33 = arith.constant 0 : index
    %106 = vector.load %arg3[%c0_32, %c0_33] : memref<32x32xbf16, #tpu.memory_space<vmem>>, vector<32x32xbf16>
    %cst_34 = arith.constant dense<0.000000e+00> : vector<16x32xf32>
    %107 = tpu.matmul %105, %106, %cst_34 {dimension_numbers = #tpu.dot_dimension_numbers<[1], [0], [0], [1], [0, 0, 1, 1], [], []>} : vector<16x32xbf16>, vector<32x32xbf16>, vector<16x32xf32> -> vector<16x32xf32>
    %108 = vector.extract_strided_slice %86 {offsets = [3, 0], sizes = [1, 32], strides = [1, 1]} : vector<6x32xf32> to vector<1x32xf32>
    %109 = vector.shape_cast %108 : vector<1x32xf32> to vector<32xf32>
    %110 = vector.shape_cast %109 : vector<32xf32> to vector<1x32xf32>
    %111 = vector.broadcast %110 : vector<1x32xf32> to vector<16x32xf32>
    %112 = arith.addf %107, %111 : vector<16x32xf32>
    %cst_35 = arith.constant 0.000000e+00 : f32
    %113 = vector.broadcast %cst_35 : f32 to vector<16x32xf32>
    %114 = arith.maximumf %112, %113 : vector<16x32xf32>
    %115 = arith.addf %104, %114 : vector<16x32xf32>
    %116 = vector.extract_strided_slice %86 {offsets = [4, 0], sizes = [1, 32], strides = [1, 1]} : vector<6x32xf32> to vector<1x32xf32>
    %117 = vector.shape_cast %116 : vector<1x32xf32> to vector<32xf32>
    %118 = vector.shape_cast %117 : vector<32xf32> to vector<1x32xf32>
    %119 = vector.broadcast %118 : vector<1x32xf32> to vector<16x32xf32>
    %120 = arith.mulf %115, %119 : vector<16x32xf32>
    %121 = vector.extract_strided_slice %86 {offsets = [5, 0], sizes = [1, 32], strides = [1, 1]} : vector<6x32xf32> to vector<1x32xf32>
    %122 = vector.shape_cast %121 : vector<1x32xf32> to vector<32xf32>
    %123 = vector.shape_cast %122 : vector<32xf32> to vector<1x32xf32>
    %124 = vector.broadcast %123 : vector<1x32xf32> to vector<16x32xf32>
    %125 = arith.addf %120, %124 : vector<16x32xf32>
    %c0_36 = arith.constant 0 : index
    %c0_37 = arith.constant 0 : index
    %126 = vector.load %arg5[%c0_36, %c0_37] : memref<16x32xf32, #tpu.memory_space<vmem>>, vector<16x32xf32>
    tpu.vector_store %arg5[%c0_36, %c0_37], %125 {strides = array<i32>} : memref<16x32xf32, #tpu.memory_space<vmem>>, vector<16x32xf32>,
    return
  }
}

</mosaic_0001>

<bundles_post_ra>
// kernel: tpu_custom_call.1
= control target key start
LH: loop header
LB: loop body
LE: loop exit
PB: predicated region body
PF: predicated region fallthrough
CT: control target
= control target key end

     0   :  { %10 = vsyncpa [#allocation3], 0  ;;  %s1940_s0 = inlined_call_operand.hbm [shape: f32[64,128], index: 0, kind: input, shape index: {}]   ;;  %s1941_s1 = inlined_call_operand.vmem [shape: f32[3,64,64], index: 1, kind: input, shape index: {}]   ;;  %s1942_s2 = inlined_call_operand.vmem [shape: bf16[128,176], index: 2, kind: input, shape index: {}]   ;;  %s1943_s3 = inlined_call_operand.vmem [shape: bf16[32,32], index: 3, kind: input, shape index: {}]   ;;  %s1944_s4 = inlined_call_operand.vmem [shape: f32[6,32], index: 4, kind: input, shape index: {}]   ;;  %s1945_s5 = inlined_call_operand.hbm [shape: f32[16,32], index: 5, kind: output, shape index: {}]  }
   0x1   :  { %11 = vsyncpa [#allocation4], 0  ;;  %s16_s20 = sshll.u32 %s1940_s0, 4  ;;  %s1339_s21 = smov [#allocation2]   ;;  %s17_s20 = int_to_ptr.hbm [resolvable:$true] %s16_s20 }
   0x2   :  { %s18_s22 = sshll.u32 %s1339_s21, 4  ;;  %s1340_s23 = smov 128   ;;  %s19_s22 = int_to_ptr.vmem [resolvable:$true] %s18_s22 }
   0x3   :  { %s1341_s24 = smov 8  }
   0x4   :  { %24 = dma.hbm_to_vmem [thread:$0]  %s17_s20, 1024, %s19_s22, [#allocation3], %s1340_s23, %s1340_s23, %s1341_s24  }
   0x5   :  { %1335 = dma.done.wait [#allocation3], 1024  }
   0x6   :  { %1336 = vsyncadd [#allocation3], 4294966272  ;;  %v1107_v0 = vld [vmem:[%s1942_s2 + $0x70] sm:$0xf]  ;;  %v1177_v1 = vld [vmem:[%s1942_s2 + $0x74] sm:$0xf0] }
   0x7   :  { %v1176_v2 = vld [vmem:[%s1942_s2 + $0x74] sm:$0xf]  ;;  %v1108_v3 = vor.u32 %v1177_v1, %v1107_v0  ;;  %v1109_v4 = vld [vmem:[%s1942_s2 + $0x78] sm:$0xf0]  ;;  %v1099_v5 = vld [vmem:[%s1942_s2 + $0x60] sm:$0xf] }
   0x8   :  { %v1175_v6 = vld [vmem:[%s1942_s2 + $0x64] sm:$0xf0]  ;;  %v1112_v7 = vor.u32 %v1176_v2, %v1109_v4  ;;  %v1174_v8 = vld [vmem:[%s1942_s2 + $0x64] sm:$0xf]  ;;  %v1101_v9 = vld [vmem:[%s1942_s2 + $0x68] sm:$0xf0] }
   0x9   :  { %146 = vmatpush.bf16.msra.mxu0 %v1108_v3  ;;  %v1100_v10 = vor.u32 %v1175_v6, %v1099_v5  ;;  %v1104_v11 = vor.u32 %v1174_v8, %v1101_v9  ;;  %v1091_v12 = vld [vmem:[%s1942_s2 + $0x50] sm:$0xf]  ;;  %v1173_v13 = vld [vmem:[%s1942_s2 + $0x54] sm:$0xf0]  ;;  %v1172_v14 = vld [vmem:[%s1942_s2 + $0x54] sm:$0xf] }
   0xa   :  { %175 = vmatpush.bf16.msra.mxu1 %v1112_v7  ;;  %v1093_v15 = vld [vmem:[%s1942_s2 + $0x58] sm:$0xf0]  ;;  %v1092_v16 = vor.u32 %v1173_v13, %v1091_v12  ;;  %v1083_v18 = vld [vmem:[%s1942_s2 + $0x40] sm:$0xf]  ;;  %v1171_v19 = vld [vmem:[%s1942_s2 + $0x44] sm:$0xf0] }
   0xb   :  { %v1096_v17 = vor.u32 %v1172_v14, %v1093_v15  ;;  %v1170_v20 = vld [vmem:[%s1942_s2 + $0x44] sm:$0xf]  ;;  %v1085_v21 = vld [vmem:[%s1942_s2 + $0x48] sm:$0xf0]  ;;  %v1084_v22 = vor.u32 %v1171_v19, %v1083_v18  ;;  %v1075_v24 = vld [vmem:[%s1942_s2 + $0x30] sm:$0xf] }
   0xc   :  { %v1088_v23 = vor.u32 %v1170_v20, %v1085_v21  ;;  %v1169_v25 = vld [vmem:[%s1942_s2 + $0x34] sm:$0xf0]  ;;  %v1168_v26 = vld [vmem:[%s1942_s2 + $0x34] sm:$0xf]  ;;  %v1077_v27 = vld [vmem:[%s1942_s2 + $0x38] sm:$0xf0] }
   0xd   :  { %147 = vmatpush.bf16.msra.mxu0 %v1100_v10  ;;  %v1076_v28 = vor.u32 %v1169_v25, %v1075_v24  ;;  %v1080_v29 = vor.u32 %v1168_v26, %v1077_v27  ;;  %v1067_v30 = vld [vmem:[%s1942_s2 + $0x20] sm:$0xf]  ;;  %v1167_v31 = vld [vmem:[%s1942_s2 + $0x24] sm:$0xf0]  ;;  %v1166_v32 = vld [vmem:[%s1942_s2 + $0x24] sm:$0xf] }
   0xe   :  { %176 = vmatpush.bf16.msra.mxu1 %v1104_v11  ;;  %v1069_v33 = vld [vmem:[%s1942_s2 + $0x28] sm:$0xf0]  ;;  %v1068_v34 = vor.u32 %v1167_v31, %v1067_v30  ;;  %v1059_v36 = vld [vmem:[%s1942_s2 + $0x10] sm:$0xf]  ;;  %v1165_v37 = vld [vmem:[%s1942_s2 + $0x14] sm:$0xf0] }
   0xf   :  { %v1072_v35 = vor.u32 %v1166_v32, %v1069_v33  ;;  %v1164_v38 = vld [vmem:[%s1942_s2 + $0x14] sm:$0xf]  ;;  %v1061_v39 = vld [vmem:[%s1942_s2 + $0x18] sm:$0xf0]  ;;  %v1060_v40 = vor.u32 %v1165_v37, %v1059_v36  ;;  %v1051_v42 = vld [vmem:[%s1942_s2] sm:$0xf] }
  0x10   :  { %v1064_v41 = vor.u32 %v1164_v38, %v1061_v39  ;;  %v1163_v43 = vld [vmem:[%s1942_s2 + $0x4] sm:$0xf0]  ;;  %v1162_v44 = vld [vmem:[%s1942_s2 + $0x4] sm:$0xf]  ;;  %v1053_v45 = vld [vmem:[%s1942_s2 + $0x8] sm:$0xf0] }
  0x11   :  { %148 = vmatpush.bf16.msra.mxu0 %v1092_v16  ;;  %v1052_v46 = vor.u32 %v1163_v43, %v1051_v42  ;;  %v38_v47 = vld [vmem:[#allocation2] sm:$0xff]  ;;  %v39_v48 = vld [vmem:[#allocation2 + $0x8] sm:$0xff]  ;;  %v1056_v49 = vor.u32 %v1162_v44, %v1053_v45  ;;  %v40_v51 = vld [vmem:[#allocation2 + $0x10] sm:$0xff]  ;;  %s1342_s2 = smov 120   ;;  %s1343_s15 = smov 104   ;;  %vm248_vm0 = vcmask 64512  }
  0x12   :  { %177 = vmatpush.bf16.msra.mxu1 %v1096_v17  ;;  %v46_v50 = vpack.c.bf16 %v39_v48, %v38_v47  ;;  %v41_v52 = vld [vmem:[#allocation2 + $0x18] sm:$0xff]  ;;  %v42_v54 = vld [vmem:[#allocation2 + $0x20] sm:$0xff]  ;;  %v43_v55 = vld [vmem:[#allocation2 + $0x28] sm:$0xff]  ;;  %s1344_s16 = smov 88   ;;  %s1345_s17 = smov 112   ;;  %vm302_vm1 = vcmask 523264  }
  0x13   :  { %v47_v53 = vpack.c.bf16 %v41_v52, %v40_v51  ;;  %v48_v56 = vpack.c.bf16 %v43_v55, %v42_v54  ;;  %v44_v57 = vld [vmem:[#allocation2 + $0x30] sm:$0xff]  ;;  %v45_v58 = vld [vmem:[#allocation2 + $0x38] sm:$0xff]  ;;  %s1346_s18 = smov 96   ;;  %s1347_s19 = smov 32   ;;  %vm1000_vm2 = vcmask 261120  }
  0x14   :  { %v49_v59 = vpack.c.bf16 %v45_v58, %v44_v57  ;;  %s1348_s20 = smov 64   ;;  %s1036_s30 = sshll.u32 %s1945_s5, 4  ;;  %s1037_s30 = int_to_ptr.hbm [resolvable:$true] %s1036_s30 }
  0x15   :  { %149 = vmatpush.bf16.msra.mxu0 %v1084_v22 }
  0x16   :  { %178 = vmatpush.bf16.msra.mxu1 %v1088_v23 }
  0x19   :  { %150 = vmatpush.bf16.msra.mxu0 %v1076_v28 }
  0x1a   :  { %179 = vmatpush.bf16.msra.mxu1 %v1080_v29 }
  0x1d   :  { %151 = vmatpush.bf16.msra.mxu0 %v1068_v34 }
  0x1e   :  { %180 = vmatpush.bf16.msra.mxu1 %v1072_v35 }
  0x21   :  { %152 = vmatpush.bf16.msra.mxu0 %v1060_v40 }
  0x22   :  { %181 = vmatpush.bf16.msra.mxu1 %v1064_v41 }
  0x25   :  { %153 = vmatpush.bf16.msra.mxu0 %v1052_v46 }
  0x26   :  { %182 = vmatpush.bf16.msra.mxu1 %v1056_v49 }
  0x28   :  { %154 = vmatmul.bf16.vlgmr.msra.gmra.mxu0 %v46_v50 }
  0x29   :  { %183 = vmatmul.bf16.vlgmr.msra.gmra.mxu1 %v46_v50 }
  0x38   :  { %159 = vmatmul.bf16.gmra.mxu0 %v47_v53 }
  0x39   :  { %188 = vmatmul.bf16.gmra.mxu1 %v47_v53 }
  0x48   :  { %164 = vmatmul.bf16.gmra.mxu0 %v48_v56 }
  0x49   :  { %193 = vmatmul.bf16.gmra.mxu1 %v48_v56 }
  0x58   :  { %169 = vmatmul.bf16.gmra.mxu0 %v49_v59 }
  0x59   :  { %198 = vmatmul.bf16.gmra.mxu1 %v49_v59 }
  0xa5   :  { %v1482_v60 = vpop.f32.mrf.mxu0 }
  0xa6   :  { %v184_v61 = vpop.f32.mrf.mxu1 }
  0xa7   :  { %v204_v62 = vpack.c.bf16 %v184_v61, %v1482_v60 }
  0xa9   :  { %v597_v2 = vunpack.c.l.b16 %v204_v62  ;;  %v228_v20 = vunpack.c.h.b16 %v204_v62 }
  0xad   :  { %v1485_v63 = vpop.f32.mrf.mxu0 }
  0xae   :  { %v186_v0 = vpop.f32.mrf.mxu1 }
  0xaf   :  { %v205_v1 = vpack.c.bf16 %v186_v0, %v1485_v63 }
  0xb1   :  { %v598_v3 = vunpack.c.l.b16 %v205_v1  ;;  %v229_v19 = vunpack.c.h.b16 %v205_v1 }
  0xb3   :  { %v1488_v4 = vpack.c.b16 %v598_v3, %v597_v2  ;;  %v1494_v21 = vpack.c.b16 %v229_v19, %v228_v20 }
  0xb5   :  { %v160_v5 = vpop.f32.mrf.mxu0 }
  0xb6   :  { %v189_v6 = vpop.f32.mrf.mxu1 }
  0xb7   :  { %v206_v7 = vpack.c.bf16 %v189_v6, %v160_v5 }
  0xb9   :  { %v230_v11 = vunpack.c.h.b16 %v206_v7  ;;  %v599_v12 = vunpack.c.l.b16 %v206_v7 }
  0xbd   :  { %v162_v8 = vpop.f32.mrf.mxu0 }
  0xbe   :  { %v191_v9 = vpop.f32.mrf.mxu1 }
  0xbf   :  { %v207_v10 = vpack.c.bf16 %v191_v9, %v162_v8 }
  0xc1   :  { %v231_v13 = vunpack.c.h.b16 %v207_v10  ;;  %v600_v14 = vunpack.c.l.b16 %v207_v10 }
  0xc3   :  { %v1490_v15 = vpack.c.b16 %v231_v13, %v230_v11  ;;  %v606_v16 = vpack.c.b16 %v600_v14, %v599_v12 }
  0xc5   :  { %242 = vrot.lane.b32.xlu1 %v1490_v15, %s1342_s2  ;;  %v165_v17 = vpop.f32.mrf.mxu0 }
  0xc6   :  { %v194_v18 = vpop.f32.mrf.mxu1 }
  0xc7   :  { %v208_v22 = vpack.c.bf16 %v194_v18, %v165_v17 }
  0xc9   :  { %v232_v26 = vunpack.c.h.b16 %v208_v22  ;;  %v601_v39 = vunpack.c.l.b16 %v208_v22 }
  0xcd   :  { %240 = vrot.lane.b32.xlu1 %v1494_v21, %s1342_s2  ;;  %v167_v23 = vpop.f32.mrf.mxu0 }
  0xce   :  { %v196_v24 = vpop.f32.mrf.mxu1 }
  0xcf   :  { %v209_v25 = vpack.c.bf16 %v196_v24, %v167_v23 }
  0xd1   :  { %v233_v27 = vunpack.c.h.b16 %v209_v25  ;;  %v602_v38 = vunpack.c.l.b16 %v209_v25 }
  0xd3   :  { %v1498_v28 = vpack.c.b16 %v233_v27, %v232_v26  ;;  %v607_v40 = vpack.c.b16 %v602_v38, %v601_v39 }
  0xd5   :  { %432 = vrot.lane.b32.xlu1 %v1498_v28, %s1343_s15  ;;  %v170_v29 = vpop.f32.mrf.mxu0 }
  0xd6   :  { %v199_v30 = vpop.f32.mrf.mxu1 }
  0xd7   :  { %v210_v31 = vpack.c.bf16 %v199_v30, %v170_v29 }
  0xd9   :  { %v234_v35 = vunpack.c.h.b16 %v210_v31  ;;  %v603_v42 = vunpack.c.l.b16 %v210_v31 }
  0xdd   :  { %732 = vrot.lane.b32.xlu1 %v1494_v21, %s1344_s16  ;;  %v172_v32 = vpop.f32.mrf.mxu0 }
  0xde   :  { %v201_v33 = vpop.f32.mrf.mxu1 }
  0xdf   :  { %v211_v34 = vpack.c.bf16 %v201_v33, %v172_v32  ;;  %v213_v33 = vld [vmem:[%s1941_s1 + $0x8] sm:$0xff] }
  0xe1   :  { %v235_v36 = vunpack.c.h.b16 %v211_v34  ;;  %v604_v41 = vunpack.c.l.b16 %v211_v34  ;;  %v1118_v34 = vld [vmem:[%s1941_s1 + $0x48] sm:$0xff] }
  0xe3   :  { %v1502_v37 = vpack.c.b16 %v235_v36, %v234_v35  ;;  %v608_v43 = vpack.c.b16 %v604_v41, %v603_v42  ;;  %v214_v41 = vld [vmem:[%s1941_s1 + $0x10] sm:$0xff]  ;;  %v215_v42 = vld [vmem:[%s1941_s1 + $0x18] sm:$0xff] }
  0xe5   :  { %420 = vrot.lane.b32.xlu1 %v1494_v21, %s1345_s17  ;;  %738 = vrot.lane.b32.xlu2 %v1502_v37, %s1344_s16 }
  0xe6   :  { %246 = vrot.lane.b32.xlu0 %v1502_v37, %s1342_s2 }
  0xed   :  { %728 = vrot.lane.b32.xlu1 %v1498_v28, %s1346_s18  ;;  %434 = vrot.lane.b32.xlu2 %v1502_v37, %s1343_s15 }
  0xee   :  { %244 = vrot.lane.b32.xlu0 %v1498_v28, %s1342_s2 }
  0xf5   :  { %426 = vrot.lane.b32.xlu1 %v1502_v37, %s1345_s17  ;;  %734 = vrot.lane.b32.xlu2 %v1490_v15, %s1344_s16 }
  0xf6   :  { %736 = vrot.lane.b32.xlu0 %v1498_v28, %s1344_s16 }
  0xfd   :  { %905 = vrot.lane.b32.xlu1 %v607_v40, %s1347_s19  ;;  %428 = vrot.lane.b32.xlu2 %v1494_v21, %s1343_s15 }
  0xfe   :  { %430 = vrot.lane.b32.xlu0 %v1490_v15, %s1343_s15 }
 0x105   :  { %903 = vrot.lane.b32.xlu1 %v606_v16, %s1347_s19  ;;  %726 = vrot.lane.b32.xlu2 %v1490_v15, %s1346_s18 }
 0x106   :  { %724 = vrot.lane.b32.xlu0 %v1494_v21, %s1346_s18 }
 0x10d   :  { %907 = vrot.lane.b32.xlu1 %v608_v43, %s1347_s19  ;;  %424 = vrot.lane.b32.xlu2 %v1498_v28, %s1345_s17 }
 0x10e   :  { %422 = vrot.lane.b32.xlu0 %v1490_v15, %s1345_s17 }
 0x115   :  { %666 = vrot.lane.b32.xlu2 %v607_v40, %s1346_s18 }
 0x116   :  { %730 = vrot.lane.b32.xlu0 %v1502_v37, %s1346_s18 }
 0x11d   :  { %664 = vrot.lane.b32.xlu2 %v606_v16, %s1346_s18 }
 0x11e   :  { %613 = vrot.lane.b32.xlu0 %v607_v40, %s1348_s20 }
 0x125   :  { %615 = vrot.lane.b32.xlu2 %v608_v43, %s1348_s20 }
 0x126   :  { %611 = vrot.lane.b32.xlu0 %v606_v16, %s1348_s20 }
 0x12e   :  { %668 = vrot.lane.b32.xlu0 %v608_v43, %s1346_s18  ;;  %v1119_v43 = vld [vmem:[%s1941_s1 + $0x50] sm:$0xff] }
 0x137   :  { %v243_v44 = vpop.permute.xlu1 %242 }
 0x138   :  { %v265_v2 = vsel %vm248_vm0, %v243_v44, 0 }
 0x13f   :  { %v241_v45 = vpop.permute.xlu1 %240  ;;  %v739_v46 = vpop.permute.xlu2 %738 }
 0x140   :  { %v262_v7 = vsel %vm248_vm0, %v241_v45, 0  ;;  %v762_v9 = vsel %vm248_vm0, %v739_v46, 0 }
 0x147   :  { %v433_v47 = vpop.permute.xlu1 %432  ;;  %v435_v48 = vpop.permute.xlu2 %434 }
 0x148   :  { %v458_v49 = vsel %vm248_vm0, %v435_v48, 0  ;;  %v455_v52 = vsel %vm248_vm0, %v433_v47, 0 }
 0x149   :  { %464 = vmatpush.bf16.xpose.msra.mxu3 %v458_v49 }
 0x14f   :  { %v733_v50 = vpop.permute.xlu1 %732  ;;  %v735_v51 = vpop.permute.xlu2 %734 }
 0x150   :  { %v756_v19 = vsel %vm248_vm0, %v735_v51, 0 }
 0x151   :  { %465 = vmatpush.bf16.xpose.msra.mxu3 %v455_v52  ;;  %v1120_v52 = vld [vmem:[%s1941_s1 + $0x58] sm:$0xff] }
 0x157   :  { %v421_v53 = vpop.permute.xlu1 %420  ;;  %v429_v54 = vpop.permute.xlu2 %428 }
 0x158   :  { %v247_v55 = vpop.permute.xlu0 %246  ;;  %v449_v13 = vsel %vm248_vm0, %v429_v54, 0 }
 0x159   :  { %v271_v56 = vsel %vm248_vm0, %v247_v55, 0 }
 0x15a   :  { %277 = vmatpush.bf16.xpose.msra.mxu2 %v271_v56 }
 0x15f   :  { %v729_v57 = vpop.permute.xlu1 %728  ;;  %v727_v58 = vpop.permute.xlu2 %726 }
 0x160   :  { %v245_v59 = vpop.permute.xlu0 %244 }
 0x161   :  { %v268_v61 = vsel %vm248_vm0, %v245_v59, 0  ;;  %v1121_v59 = vld [vmem:[%s1941_s1 + $0x60] sm:$0xff] }
 0x162   :  { %278 = vmatpush.bf16.xpose.msra.mxu2 %v268_v61 }
 0x167   :  { %v427_v62 = vpop.permute.xlu1 %426  ;;  %v425_v0 = vpop.permute.xlu2 %424 }
 0x168   :  { %v737_v1 = vpop.permute.xlu0 %736 }
 0x169   :  { %v759_v14 = vsel %vm248_vm0, %v737_v1, 0 }
 0x16a   :  { %279 = vmatpush.bf16.xpose.msra.mxu2 %v265_v2 }
 0x16f   :  { %v906_v3 = vpop.permute.xlu1 %905  ;;  %v667_v5 = vpop.permute.xlu2 %666 }
 0x170   :  { %v431_v6 = vpop.permute.xlu0 %430 }
 0x171   :  { %v452_v8 = vsel %vm248_vm0, %v431_v6, 0 }
 0x172   :  { %280 = vmatpush.bf16.xpose.msra.mxu2 %v262_v7  ;;  %466 = vmatpush.bf16.xpose.msra.mxu3 %v452_v8  ;;  %v1122_v7 = vld [vmem:[%s1941_s1 + $0x68] sm:$0xff] }
 0x177   :  { %v904_v10 = vpop.permute.xlu1 %903  ;;  %v665_v11 = vpop.permute.xlu2 %664 }
 0x178   :  { %v725_v12 = vpop.permute.xlu0 %724 }
 0x179   :  { %1113 = vmatmul.msk.bf16.vlgmr.msra.gmra.mxu2 %vm248_vm0, %v1494_v21  ;;  %v753_v21 = vsel %vm248_vm0, %v733_v50, 0 }
 0x17a   :  { %768 = vmatpush.bf16.xpose.msrb.mxu2 %v762_v9  ;;  %467 = vmatpush.bf16.xpose.msra.mxu3 %v449_v13  ;;  %v219_v13 = vld [vmem:[%s1941_s1 + $0x38] sm:$0xff] }
 0x17f   :  { %v908_v16 = vpop.permute.xlu1 %907  ;;  %v616_v17 = vpop.permute.xlu2 %615 }
 0x180   :  { %v423_v18 = vpop.permute.xlu0 %422  ;;  %637 = vmatpush.bf16.msrb.mxu0 %v616_v17 }
 0x181   :  { %1125 = vmatmul.msk.bf16.vlgmr.msra.gmra.mxu3 %vm248_vm0, %v421_v53 }
 0x182   :  { %769 = vmatpush.bf16.xpose.msrb.mxu2 %v759_v14  ;;  %929 = vmatpush.bf16.msrb.mxu3 %v908_v16  ;;  %v1123_v14 = vld [vmem:[%s1941_s1 + $0x70] sm:$0xff] }
 0x186   :  { %930 = vmatpush.bf16.msrb.mxu3 %v906_v3 }
 0x188   :  { %v731_v20 = vpop.permute.xlu0 %730 }
 0x189   :  { %1114 = vmatmul.msk.bf16.gmra.mxu2 %vm248_vm0, %v1490_v15  ;;  %v212_v15 = vld [vmem:[%s1941_s1] sm:$0xff] }
 0x18a   :  { %770 = vmatpush.bf16.xpose.msrb.mxu2 %v756_v19  ;;  %931 = vmatpush.bf16.msrb.mxu3 %v904_v10 }
 0x190   :  { %v614_v22 = vpop.permute.xlu0 %613 }
 0x191   :  { %1126 = vmatmul.msk.bf16.gmra.mxu3 %vm248_vm0, %v423_v18  ;;  %638 = vmatpush.bf16.msrb.mxu0 %v614_v22 }
 0x192   :  { %771 = vmatpush.bf16.xpose.msrb.mxu2 %v753_v21 }
 0x198   :  { %v612_v23 = vpop.permute.xlu0 %611 }
 0x199   :  { %1115 = vmatmul.msk.bf16.gmra.mxu2 %vm248_vm0, %v1498_v28  ;;  %639 = vmatpush.bf16.msrb.mxu0 %v612_v23  ;;  %v1117_v28 = vld [vmem:[%s1941_s1 + $0x40] sm:$0xff] }
 0x1a0   :  { %v669_v24 = vpop.permute.xlu0 %668 }
 0x1a1   :  { %1127 = vmatmul.msk.bf16.gmra.mxu3 %vm248_vm0, %v425_v0  ;;  %690 = vmatpush.bf16.msrb.mxu1 %v669_v24  ;;  %v1124_v24 = vld [vmem:[%s1941_s1 + $0x78] sm:$0xff] }
 0x1a5   :  { %691 = vmatpush.bf16.msrb.mxu1 %v667_v5 }
 0x1a9   :  { %1116 = vmatmul.msk.bf16.gmra.mxu2 %vm248_vm0, %v1502_v37  ;;  %692 = vmatpush.bf16.msrb.mxu1 %v665_v11 }
 0x1b1   :  { %1128 = vmatmul.msk.bf16.gmra.mxu3 %vm248_vm0, %v427_v62 }
 0x1b9   :  { %1145 = vmatmul.msk.bf16.vlgmr.msrb.gmra.mxu2 %vm248_vm0, %v725_v12  ;;  %v218_v12 = vld [vmem:[%s1941_s1 + $0x30] sm:$0xff] }
 0x1c9   :  { %1146 = vmatmul.msk.bf16.gmra.mxu2 %vm248_vm0, %v727_v58  ;;  %v217_v58 = vld [vmem:[%s1941_s1 + $0x28] sm:$0xff] }
 0x1d9   :  { %1147 = vmatmul.msk.bf16.gmra.mxu2 %vm248_vm0, %v729_v57  ;;  %v216_v57 = vld [vmem:[%s1941_s1 + $0x20] sm:$0xff] }
 0x1e9   :  { %1148 = vmatmul.msk.bf16.gmra.mxu2 %vm248_vm0, %v731_v20 }
 0x1fc   :  { %v282_v25 = vpop.f32.mrf.mxu2 }
 0x1fd   :  { %v1566_v26 = vadd.f32 %v282_v25, %v212_v15  ;;  %v1137_v15 = vld [vmem:[%s1941_s1 + $0x80] sm:$0xff] }
 0x1ff   :  { %v303_v27 = vsel %vm302_vm1, %v1566_v26, -inf }
 0x200   :  { %304 = vmax.xlane.f32.xlu1 %v303_v27 }
 0x204   :  { %v284_v29 = vpop.f32.mrf.mxu2  ;;  %v469_v30 = vpop.f32.mrf.mxu3 }
 0x205   :  { %v1573_v31 = vadd.f32 %v1117_v28, %v469_v30  ;;  %v1583_v35 = vadd.f32 %v284_v29, %v213_v33  ;;  %v1138_v33 = vld [vmem:[%s1941_s1 + $0x88] sm:$0xff] }
 0x207   :  { %v489_v32 = vsel %vm302_vm1, %v1573_v31, -inf  ;;  %v306_v40 = vsel %vm302_vm1, %v1583_v35, -inf }
 0x208   :  { %490 = vmax.xlane.f32.xlu2 %v489_v32 }
 0x20c   :  { %v287_v36 = vpop.f32.mrf.mxu2  ;;  %v471_v37 = vpop.f32.mrf.mxu3 }
 0x20d   :  { %v1585_v38 = vadd.f32 %v1118_v34, %v471_v37  ;;  %v1600_v44 = vadd.f32 %v287_v36, %v214_v41 }
 0x20f   :  { %v492_v39 = vsel %vm302_vm1, %v1585_v38, -inf  ;;  %v309_v50 = vsel %vm302_vm1, %v1600_v44, -inf }
 0x210   :  { %493 = vmax.xlane.f32.xlu0 %v492_v39  ;;  %307 = vmax.xlane.f32.xlu2 %v306_v40  ;;  %v1139_v39 = vld [vmem:[%s1941_s1 + $0x90] sm:$0xff] }
 0x214   :  { %v289_v45 = vpop.f32.mrf.mxu2  ;;  %v474_v46 = vpop.f32.mrf.mxu3 }
 0x215   :  { %v1602_v47 = vadd.f32 %v289_v45, %v215_v42  ;;  %v1604_v48 = vadd.f32 %v1119_v43, %v474_v46  ;;  %v1140_v43 = vld [vmem:[%s1941_s1 + $0x98] sm:$0xff] }
 0x217   :  { %v312_v49 = vsel %vm302_vm1, %v1602_v47, -inf  ;;  %v495_v51 = vsel %vm302_vm1, %v1604_v48, -inf }
 0x218   :  { %313 = vmax.xlane.f32.xlu1 %v312_v49  ;;  %310 = vmax.xlane.f32.xlu0 %v309_v50  ;;  %v1141_v50 = vld [vmem:[%s1941_s1 + $0xa0] sm:$0xff] }
 0x219   :  { %496 = vmax.xlane.f32.xlu2 %v495_v51 }
 0x21c   :  { %v292_v53 = vpop.f32.mrf.mxu2  ;;  %v476_v54 = vpop.f32.mrf.mxu3 }
 0x21d   :  { %v1615_v55 = vadd.f32 %v1120_v52, %v476_v54  ;;  %v1628_v61 = vadd.f32 %v292_v53, %v216_v57  ;;  %v1142_v54 = vld [vmem:[%s1941_s1 + $0xa8] sm:$0xff] }
 0x21f   :  { %v498_v56 = vsel %vm302_vm1, %v1615_v55, -inf  ;;  %v315_v5 = vsel %vm302_vm1, %v1628_v61, -inf }
 0x220   :  { %499 = vmax.xlane.f32.xlu0 %v498_v56 }
 0x224   :  { %v294_v62 = vpop.f32.mrf.mxu2  ;;  %v479_v0 = vpop.f32.mrf.mxu3 }
 0x225   :  { %v1630_v1 = vadd.f32 %v294_v62, %v217_v58  ;;  %v1632_v2 = vadd.f32 %v1121_v59, %v479_v0  ;;  %v1143_v59 = vld [vmem:[%s1941_s1 + $0xb0] sm:$0xff] }
 0x227   :  { %v318_v3 = vsel %vm302_vm1, %v1630_v1, -inf  ;;  %v501_v6 = vsel %vm302_vm1, %v1632_v2, -inf }
 0x228   :  { %319 = vmax.xlane.f32.xlu1 %v318_v3  ;;  %316 = vmax.xlane.f32.xlu0 %v315_v5  ;;  %v1144_v5 = vld [vmem:[%s1941_s1 + $0xb8] sm:$0xff] }
 0x229   :  { %502 = vmax.xlane.f32.xlu2 %v501_v6 }
 0x22c   :  { %v297_v8 = vpop.f32.mrf.mxu2  ;;  %v481_v9 = vpop.f32.mrf.mxu3 }
 0x22d   :  { %v1643_v10 = vadd.f32 %v1122_v7, %v481_v9  ;;  %v1656_v16 = vadd.f32 %v297_v8, %v218_v12 }
 0x22f   :  { %v504_v11 = vsel %vm302_vm1, %v1643_v10, -inf  ;;  %v321_v22 = vsel %vm302_vm1, %v1656_v16, -inf }
 0x230   :  { %505 = vmax.xlane.f32.xlu0 %v504_v11 }
 0x234   :  { %v299_v17 = vpop.f32.mrf.mxu2  ;;  %v484_v18 = vpop.f32.mrf.mxu3 }
 0x235   :  { %v1658_v19 = vadd.f32 %v299_v17, %v219_v13  ;;  %v1660_v20 = vadd.f32 %v1123_v14, %v484_v18 }
 0x237   :  { %v324_v21 = vsel %vm302_vm1, %v1658_v19, -inf  ;;  %v507_v23 = vsel %vm302_vm1, %v1660_v20, -inf }
 0x238   :  { %325 = vmax.xlane.f32.xlu1 %v324_v21  ;;  %322 = vmax.xlane.f32.xlu0 %v321_v22 }
 0x239   :  { %508 = vmax.xlane.f32.xlu2 %v507_v23 }
 0x23c   :  { %v486_v25 = vpop.f32.mrf.mxu3  ;;  %v773_v27 = vpop.f32.mrf.mxu2 }
 0x23d   :  { %v1674_v28 = vadd.f32 %v1124_v24, %v486_v25  ;;  %v1676_v29 = vadd.f32 %v1137_v15, %v773_v27 }
 0x23f   :  { %v510_v30 = vsel %vm302_vm1, %v1674_v28, -inf  ;;  %v793_v32 = vsel %vm302_vm1, %v1676_v29, -inf }
 0x240   :  { %511 = vmax.xlane.f32.xlu0 %v510_v30 }
 0x241   :  { %794 = vmax.xlane.f32.xlu2 %v793_v32 }
 0x244   :  { %v775_v34 = vpop.f32.mrf.mxu2 }
 0x245   :  { %v1685_v36 = vadd.f32 %v1138_v33, %v775_v34 }
 0x247   :  { %v796_v37 = vsel %vm302_vm1, %v1685_v36, -inf }
 0x248   :  { %797 = vmax.xlane.f32.xlu0 %v796_v37 }
 0x24c   :  { %v778_v40 = vpop.f32.mrf.mxu2 }
 0x24d   :  { %v1692_v41 = vadd.f32 %v1139_v39, %v778_v40 }
 0x24f   :  { %v799_v42 = vsel %vm302_vm1, %v1692_v41, -inf }
 0x250   :  { %800 = vmax.xlane.f32.xlu1 %v799_v42 }
 0x254   :  { %v780_v45 = vpop.f32.mrf.mxu2 }
 0x255   :  { %v1699_v46 = vadd.f32 %v1140_v43, %v780_v45 }
 0x257   :  { %v802_v49 = vsel %vm302_vm1, %v1699_v46, -inf }
 0x258   :  { %803 = vmax.xlane.f32.xlu2 %v802_v49 }
 0x25c   :  { %v783_v51 = vpop.f32.mrf.mxu2 }
 0x25d   :  { %v1706_v52 = vadd.f32 %v1141_v50, %v783_v51 }
 0x25f   :  { %v805_v53 = vsel %vm302_vm1, %v1706_v52, -inf }
 0x260   :  { %806 = vmax.xlane.f32.xlu1 %v805_v53 }
 0x264   :  { %v785_v56 = vpop.f32.mrf.mxu2 }
 0x265   :  { %v1713_v57 = vadd.f32 %v1142_v54, %v785_v56 }
 0x267   :  { %v808_v58 = vsel %vm302_vm1, %v1713_v57, -inf }
 0x268   :  { %809 = vmax.xlane.f32.xlu2 %v808_v58 }
 0x26c   :  { %v788_v62 = vpop.f32.mrf.mxu2 }
 0x26d   :  { %v1720_v0 = vadd.f32 %v1143_v59, %v788_v62 }
 0x26f   :  { %v811_v3 = vsel %vm302_vm1, %v1720_v0, -inf }
 0x270   :  { %812 = vmax.xlane.f32.xlu1 %v811_v3 }
 0x273   :  { %v305_v6 = vpop.xlane.xlu1 %304 }
 0x274   :  { %v327_v7 = vmax.f32 %v305_v6, -1e+30  ;;  %v790_v8 = vpop.f32.mrf.mxu2 }
 0x275   :  { %v1727_v9 = vadd.f32 %v1144_v5, %v790_v8 }
 0x276   :  { %v335_v11 = vsub.f32 %v1566_v26, %v327_v7 }
 0x277   :  { %v814_v12 = vsel %vm302_vm1, %v1727_v9, -inf }
 0x278   :  { %v343_v13 = vmul.f32 1.442695, %v335_v11  ;;  %815 = vmax.xlane.f32.xlu2 %v814_v12 }
 0x27a   :  { %1191 = vpow2.f32 %v343_v13 }
 0x27b   :  { %v491_v14 = vpop.xlane.xlu2 %490 }
 0x27c   :  { %v513_v17 = vmax.f32 %v491_v14, -1e+30 }
 0x27e   :  { %v521_v18 = vsub.f32 %v1573_v31, %v513_v17 }
 0x280   :  { %v1733_v21 = vpop.eup %1191  ;;  %v529_v22 = vmul.f32 1.442695, %v521_v18 }
 0x281   :  { %v359_v23 = vsel %vm302_vm1, %v1733_v21, 0.0 }
 0x282   :  { %1193 = vpow2.f32 %v529_v22  ;;  %360 = vadd.xlane.f32.xlu1 %v359_v23 }
 0x283   :  { %v308_v24 = vpop.xlane.xlu2 %307  ;;  %v494_v26 = vpop.xlane.xlu0 %493 }
 0x284   :  { %v328_v15 = vmax.f32 %v308_v24, -1e+30  ;;  %v514_v25 = vmax.f32 %v494_v26, -1e+30 }
 0x286   :  { %v336_v27 = vsub.f32 %v1583_v35, %v328_v15  ;;  %v522_v30 = vsub.f32 %v1585_v38, %v514_v25 }
 0x288   :  { %v1739_v32 = vpop.eup %1193  ;;  %v345_v33 = vmul.f32 1.442695, %v336_v27  ;;  %v531_v31 = vmul.f32 1.442695, %v522_v30 }
 0x289   :  { %v545_v34 = vsel %vm302_vm1, %v1739_v32, 0.0 }
 0x28a   :  { %1195 = vpow2.f32 %v345_v33  ;;  %546 = vadd.xlane.f32.xlu2 %v545_v34 }
 0x28b   :  { %1197 = vpow2.f32 %v531_v31  ;;  %v1743_v37 = vpop.xlane.xlu0 %310  ;;  %v314_v23 = vpop.xlane.xlu1 %313 }
 0x28c   :  { %v497_v45 = vpop.xlane.xlu2 %496 }
 0x28d   :  { %v515_v14 = vmax.f32 %v497_v45, -1e+30 }
 0x290   :  { %v1745_v39 = vpop.eup %1195 }
 0x291   :  { %v1747_v40 = vpop.eup %1197  ;;  %v362_v35 = vsel %vm302_vm1, %v1745_v39, 0.0 }
 0x292   :  { %363 = vadd.xlane.f32.xlu0 %v362_v35  ;;  %v548_v38 = vsel %vm302_vm1, %v1747_v40, 0.0 }
 0x293   :  { %549 = vadd.xlane.f32.xlu1 %v548_v38  ;;  %v1753_v42 = vpop.xlane.xlu0 %499 }
 0x29b   :  { %v1755_v43 = vpop.xlane.xlu0 %316  ;;  %v1783_v27 = vpop.xlane.xlu1 %319 }
 0x29c   :  { %v503_v50 = vpop.xlane.xlu2 %502 }
 0x2a3   :  { %v1757_v49 = vpop.xlane.xlu0 %505 }
 0x2ab   :  { %v1759_v51 = vpop.xlane.xlu0 %322  ;;  %v1793_v45 = vpop.xlane.xlu1 %325 }
 0x2ac   :  { %v509_v53 = vpop.xlane.xlu2 %508  ;;  %609 = vrot.lane.b32.xlu1 %v1488_v4, %s1348_s20 }
 0x2b3   :  { %v1763_v54 = vpop.xlane.xlu0 %511 }
 0x2b4   :  { %v795_v56 = vpop.xlane.xlu2 %794 }
 0x2b5   :  { %v817_v58 = vmax.f32 %v795_v56, -1e+30 }
 0x2b7   :  { %v825_v59 = vsub.f32 %v1676_v29, %v817_v58 }
 0x2b9   :  { %v833_v62 = vmul.f32 1.442695, %v825_v59 }
 0x2bb   :  { %1199 = vpow2.f32 %v833_v62  ;;  %v798_v3 = vpop.xlane.xlu0 %797  ;;  %v329_v62 = vmax.f32 %v1743_v37, -1e+30 }
 0x2bc   :  { %v818_v5 = vmax.f32 %v798_v3, -1e+30 }
 0x2be   :  { %v826_v6 = vsub.f32 %v1685_v36, %v818_v5  ;;  %v523_v36 = vsub.f32 %v1604_v48, %v515_v14 }
 0x2c0   :  { %v835_v7 = vmul.f32 1.442695, %v826_v6  ;;  %v533_v24 = vmul.f32 1.442695, %v523_v36 }
 0x2c1   :  { %v1767_v8 = vpop.eup %1199 }
 0x2c2   :  { %1201 = vpow2.f32 %v835_v7  ;;  %v849_v11 = vsel %vm302_vm1, %v1767_v8, 0.0 }
 0x2c3   :  { %850 = vadd.xlane.f32.xlu2 %v849_v11  ;;  %v801_v58 = vpop.xlane.xlu1 %800  ;;  %v337_v11 = vsub.f32 %v1600_v44, %v329_v62 }
 0x2c5   :  { %v347_v14 = vmul.f32 1.442695, %v337_v11 }
 0x2c8   :  { %v1771_v12 = vpop.eup %1201 }
 0x2c9   :  { %v852_v13 = vsel %vm302_vm1, %v1771_v12, 0.0 }
 0x2ca   :  { %853 = vadd.xlane.f32.xlu0 %v852_v13  ;;  %v819_v13 = vmax.f32 %v801_v58, -1e+30 }
 0x2cb   :  { %v804_v29 = vpop.xlane.xlu2 %803 }
 0x2cc   :  { %v820_v17 = vmax.f32 %v804_v29, -1e+30  ;;  %v827_v37 = vsub.f32 %v1692_v41, %v819_v13  ;;  %v331_v41 = vmax.f32 %v1755_v43, -1e+30 }
 0x2ce   :  { %v828_v18 = vsub.f32 %v1699_v46, %v820_v17  ;;  %v517_v46 = vmax.f32 %v503_v50, -1e+30  ;;  %v516_v17 = vmax.f32 %v1753_v42, -1e+30  ;;  %v837_v36 = vmul.f32 1.442695, %v827_v37 }
 0x2d0   :  { %v839_v22 = vmul.f32 1.442695, %v828_v18  ;;  %v525_v31 = vsub.f32 %v1632_v2, %v517_v46  ;;  %v524_v44 = vsub.f32 %v1615_v55, %v516_v17  ;;  %v339_v55 = vsub.f32 %v1628_v61, %v331_v41 }
 0x2d2   :  { %1203 = vpow2.f32 %v839_v22  ;;  %v537_v38 = vmul.f32 1.442695, %v525_v31  ;;  %v535_v42 = vmul.f32 1.442695, %v524_v44  ;;  %v351_v43 = vmul.f32 1.442695, %v339_v55 }
 0x2d3   :  { %1205 = vpow2.f32 %v533_v24  ;;  %v807_v29 = vpop.xlane.xlu1 %806 }
 0x2d8   :  { %v1777_v26 = vpop.eup %1203 }
 0x2d9   :  { %v858_v15 = vsel %vm302_vm1, %v1777_v26, 0.0  ;;  %v1785_v48 = vpop.eup %1205 }
 0x2da   :  { %859 = vadd.xlane.f32.xlu1 %v858_v15  ;;  %v551_v35 = vsel %vm302_vm1, %v1785_v48, 0.0 }
 0x2db   :  { %662 = vrot.lane.b32.xlu2 %v1488_v4, %s1346_s18  ;;  %v810_v25 = vpop.xlane.xlu2 %809 }
 0x2dc   :  { %v822_v30 = vmax.f32 %v810_v25, -1e+30 }
 0x2de   :  { %v830_v33 = vsub.f32 %v1713_v57, %v822_v30  ;;  %901 = vrot.lane.b32.xlu0 %v1488_v4, %s1347_s19  ;;  %v519_v4 = vmax.f32 %v509_v53, -1e+30  ;;  %v821_v30 = vmax.f32 %v807_v29, -1e+30 }
 0x2e0   :  { %v843_v34 = vmul.f32 1.442695, %v830_v33  ;;  %v527_v5 = vsub.f32 %v1660_v20, %v519_v4 }
 0x2e2   :  { %1207 = vpow2.f32 %v843_v34  ;;  %552 = vadd.xlane.f32.xlu1 %v551_v35  ;;  %v541_v53 = vmul.f32 1.442695, %v527_v5  ;;  %v518_v34 = vmax.f32 %v1757_v49, -1e+30  ;;  %v829_v35 = vsub.f32 %v1706_v52, %v821_v30 }
 0x2e3   :  { %1209 = vpow2.f32 %v537_v38  ;;  %v813_v22 = vpop.xlane.xlu1 %812 }
 0x2e4   :  { %v841_v4 = vmul.f32 1.442695, %v829_v35 }
 0x2e8   :  { %v1795_v50 = vpop.eup %1207 }
 0x2e9   :  { %v864_v57 = vsel %vm302_vm1, %v1795_v50, 0.0  ;;  %v1799_v59 = vpop.eup %1209 }
 0x2ea   :  { %865 = vadd.xlane.f32.xlu1 %v864_v57  ;;  %v557_v7 = vsel %vm302_vm1, %v1799_v59, 0.0  ;;  %v332_v57 = vmax.f32 %v1783_v27, -1e+30 }
 0x2eb   :  { %v816_v56 = vpop.xlane.xlu2 %815 }
 0x2ec   :  { %v824_v2 = vmax.f32 %v816_v56, -1e+30  ;;  %v526_v56 = vsub.f32 %v1643_v10, %v518_v34  ;;  %v340_v52 = vsub.f32 %v1630_v1, %v332_v57 }
 0x2ee   :  { %v832_v3 = vsub.f32 %v1727_v9, %v824_v2  ;;  %v330_v9 = vmax.f32 %v314_v23, -1e+30  ;;  %v539_v62 = vmul.f32 1.442695, %v526_v56  ;;  %v353_v11 = vmul.f32 1.442695, %v340_v52 }
 0x2f0   :  { %v847_v6 = vmul.f32 1.442695, %v832_v3  ;;  %v338_v15 = vsub.f32 %v1602_v47, %v330_v9  ;;  %v333_v3 = vmax.f32 %v1759_v51, -1e+30  ;;  %v334_v9 = vmax.f32 %v1793_v45, -1e+30 }
 0x2f2   :  { %1211 = vpow2.f32 %v847_v6  ;;  %558 = vadd.xlane.f32.xlu1 %v557_v7  ;;  %v349_v23 = vmul.f32 1.442695, %v338_v15  ;;  %v341_v13 = vsub.f32 %v1656_v16, %v333_v3 }
 0x2f3   :  { %1213 = vpow2.f32 %v541_v53  ;;  %v823_v53 = vmax.f32 %v813_v22, -1e+30 }
 0x2f4   :  { %1215 = vpow2.f32 %v347_v14  ;;  %v355_v29 = vmul.f32 1.442695, %v341_v13  ;;  %v520_v14 = vmax.f32 %v1763_v54, -1e+30 }
 0x2f5   :  { %1217 = vpow2.f32 %v837_v36  ;;  %v1827_v47 = vpop.xlane.xlu1 %360  ;;  %v831_v17 = vsub.f32 %v1720_v0, %v823_v53 }
 0x2f6   :  { %1219 = vpow2.f32 %v535_v42  ;;  %v528_v44 = vsub.f32 %v1674_v28, %v520_v14  ;;  %v342_v42 = vsub.f32 %v1658_v19, %v334_v9  ;;  %v383_v56 = vmax.f32 %v1827_v47, 1e-30 }
 0x2f7   :  { %1221 = vpow2.f32 %v349_v23  ;;  %v845_v36 = vmul.f32 1.442695, %v831_v17 }
 0x2f8   :  { %v1809_v18 = vpop.eup %1211  ;;  %1223 = vpow2.f32 %v351_v43  ;;  %v543_v41 = vmul.f32 1.442695, %v528_v44  ;;  %v357_v30 = vmul.f32 1.442695, %v342_v42 }
 0x2f9   :  { %v870_v20 = vsel %vm302_vm1, %v1809_v18, 0.0  ;;  %v1814_v24 = vpop.eup %1213  ;;  %1225 = vpow2.f32 %v841_v4 }
 0x2fa   :  { %871 = vadd.xlane.f32.xlu1 %v870_v20  ;;  %v1818_v25 = vpop.eup %1215  ;;  %v563_v46 = vsel %vm302_vm1, %v1814_v24, 0.0  ;;  %1227 = vpow2.f32 %v539_v62 }
 0x2fb   :  { %v365_v33 = vsel %vm302_vm1, %v1818_v25, 0.0  ;;  %v1825_v31 = vpop.eup %1217 }
 0x2fc   :  { %v855_v38 = vsel %vm302_vm1, %v1825_v31, 0.0  ;;  %v1833_v61 = vpop.eup %1219 }
 0x2fd   :  { %v554_v58 = vsel %vm302_vm1, %v1833_v61, 0.0  ;;  %v1839_v2 = vpop.eup %1221  ;;  %v547_v5 = vpop.xlane.xlu2 %546 }
 0x2fe   :  { %v368_v27 = vsel %vm302_vm1, %v1839_v2, 0.0  ;;  %v1845_v10 = vpop.eup %1223  ;;  %v569_v7 = vmax.f32 %v547_v5, 1e-30 }
 0x2ff   :  { %v371_v1 = vsel %vm302_vm1, %v1845_v10, 0.0  ;;  %v1850_v51 = vpop.eup %1225 }
 0x300   :  { %v861_v37 = vsel %vm302_vm1, %v1850_v51, 0.0  ;;  %v1856_v20 = vpop.eup %1227 }
 0x301   :  { %v560_v15 = vsel %vm302_vm1, %v1856_v20, 0.0 }
 0x302   :  { %564 = vadd.xlane.f32.xlu1 %v563_v46 }
 0x304   :  { %366 = vadd.xlane.f32.xlu2 %v365_v33 }
 0x305   :  { %v364_v35 = vpop.xlane.xlu0 %363 }
 0x306   :  { %v550_v49 = vpop.xlane.xlu1 %549 }
 0x307   :  { %v570_v6 = vmax.f32 %v550_v49, 1e-30 }
 0x308   :  { %856 = vadd.xlane.f32.xlu0 %v855_v38  ;;  %v384_v38 = vmax.f32 %v364_v35, 1e-30 }
 0x309   :  { %1229 = vrcp.f32 %v570_v6 }
 0x30a   :  { %1231 = vrcp.f32 %v569_v7 }
 0x30b   :  { %1233 = vpow2.f32 %v353_v11 }
 0x30c   :  { %555 = vadd.xlane.f32.xlu2 %v554_v58  ;;  %1235 = vpow2.f32 %v355_v29 }
 0x30d   :  { %1237 = vpow2.f32 %v845_v36 }
 0x30e   :  { %1239 = vpow2.f32 %v543_v41 }
 0x30f   :  { %v1230_v16 = vpop.eup %1229  ;;  %1241 = vpow2.f32 %v357_v30 }
 0x310   :  { %369 = vadd.xlane.f32.xlu0 %v368_v27  ;;  %v1232_v22 = vpop.eup %1231  ;;  %v586_v0 = vmul.f32 %v1230_v16, %v1747_v40  ;;  %1243 = vrcp.f32 %v384_v38 }
 0x311   :  { %v1862_v54 = vpop.eup %1233  ;;  %v585_v46 = vmul.f32 %v1232_v22, %v1739_v32  ;;  %1245 = vrcp.f32 %v383_v56 }
 0x312   :  { %v374_v28 = vsel %vm302_vm1, %v1862_v54, 0.0  ;;  %v1869_v23 = vpop.eup %1235 }
 0x313   :  { %v593_v55 = vpack.c.bf16 %v586_v0, %v585_v46  ;;  %v377_v19 = vsel %vm302_vm1, %v1869_v23, 0.0  ;;  %v1874_v40 = vpop.eup %1237 }
 0x314   :  { %372 = vadd.xlane.f32.xlu2 %v371_v1  ;;  %v867_v32 = vsel %vm302_vm1, %v1874_v40, 0.0  ;;  %v1878_v33 = vpop.eup %1239 }
 0x315   :  { %v566_v43 = vsel %vm302_vm1, %v1878_v33, 0.0  ;;  %v1882_v34 = vpop.eup %1241 }
 0x316   :  { %v380_v57 = vsel %vm302_vm1, %v1882_v34, 0.0  ;;  %v1244_v58 = vpop.eup %1243 }
 0x317   :  { %v1246_v49 = vpop.eup %1245  ;;  %v400_v52 = vmul.f32 %v1244_v58, %v1745_v39 }
 0x318   :  { %862 = vadd.xlane.f32.xlu0 %v861_v37  ;;  %v399_v62 = vmul.f32 %v1246_v49, %v1733_v21 }
 0x31a   :  { %v407_v6 = vpack.c.bf16 %v400_v52, %v399_v62 }
 0x31c   :  { %561 = vadd.xlane.f32.xlu2 %v560_v15 }
 0x31e   :  { %v610_v45 = vpop.permute.xlu1 %609 }
 0x31f   :  { %640 = vmatpush.bf16.msrb.mxu0 %v610_v45 }
 0x320   :  { %375 = vadd.xlane.f32.xlu0 %v374_v28 }
 0x322   :  { %1129 = vmatmul.msk.bf16.vlgmr.msrb.gmra.mxu0 %vm302_vm1, %v593_v55 }
 0x324   :  { %378 = vadd.xlane.f32.xlu2 %v377_v19 }
 0x328   :  { %868 = vadd.xlane.f32.xlu0 %v867_v32 }
 0x32c   :  { %567 = vadd.xlane.f32.xlu2 %v566_v43 }
 0x330   :  { %381 = vadd.xlane.f32.xlu0 %v380_v57 }
 0x336   :  { %v851_v4 = vpop.xlane.xlu2 %850 }
 0x337   :  { %v873_v7 = vmax.f32 %v851_v4, 1e-30 }
 0x33d   :  { %v854_v5 = vpop.xlane.xlu0 %853 }
 0x33e   :  { %v663_v3 = vpop.permute.xlu2 %662  ;;  %v874_v27 = vmax.f32 %v854_v5, 1e-30 }
 0x33f   :  { %693 = vmatpush.bf16.msrb.mxu1 %v663_v3 }
 0x340   :  { %1247 = vrcp.f32 %v874_v27 }
 0x341   :  { %1249 = vrcp.f32 %v873_v7 }
 0x342   :  { %1133 = vmatmul.msk.bf16.vlgmr.msrb.gmra.mxu1 %vm302_vm1, %v407_v6 }
 0x346   :  { %v1248_v47 = vpop.eup %1247 }
 0x347   :  { %v1250_v11 = vpop.eup %1249  ;;  %v890_v13 = vmul.f32 %v1248_v47, %v1771_v12 }
 0x348   :  { %v889_v53 = vmul.f32 %v1250_v11, %v1767_v8 }
 0x34a   :  { %v897_v39 = vpack.c.bf16 %v890_v13, %v889_v53 }
 0x34d   :  { %v860_v21 = vpop.xlane.xlu1 %859 }
 0x34e   :  { %v876_v17 = vmax.f32 %v860_v21, 1e-30 }
 0x350   :  { %v902_v1 = vpop.permute.xlu0 %901  ;;  %1251 = vrcp.f32 %v876_v17 }
 0x351   :  { %932 = vmatpush.bf16.msrb.mxu3 %v902_v1 }
 0x354   :  { %1149 = vmatmul.msk.bf16.vlgmr.msrb.gmra.mxu3 %vm302_vm1, %v897_v39 }
 0x355   :  { %v553_v29 = vpop.xlane.xlu1 %552 }
 0x356   :  { %v571_v9 = vmax.f32 %v553_v29, 1e-30  ;;  %v1252_v8 = vpop.eup %1251 }
 0x357   :  { %v892_v45 = vmul.f32 %v1252_v8, %v1777_v26 }
 0x35d   :  { %v866_v37 = vpop.xlane.xlu1 %865 }
 0x35e   :  { %v878_v32 = vmax.f32 %v866_v37, 1e-30 }
 0x365   :  { %v559_v41 = vpop.xlane.xlu1 %558 }
 0x36d   :  { %v872_v52 = vpop.xlane.xlu1 %871 }
 0x36e   :  { %v880_v1 = vmax.f32 %v872_v52, 1e-30 }
 0x375   :  { %v565_v39 = vpop.xlane.xlu1 %564 }
 0x377   :  { %v367_v14 = vpop.xlane.xlu2 %366 }
 0x378   :  { %v385_v12 = vmax.f32 %v367_v14, 1e-30 }
 0x37b   :  { %v857_v16 = vpop.xlane.xlu0 %856 }
 0x37c   :  { %v875_v44 = vmax.f32 %v857_v16, 1e-30 }
 0x37e   :  { %1253 = vrcp.f32 %v875_v44 }
 0x37f   :  { %v556_v36 = vpop.xlane.xlu2 %555  ;;  %1255 = vrcp.f32 %v571_v9 }
 0x380   :  { %v572_v22 = vmax.f32 %v556_v36, 1e-30 }
 0x382   :  { %1257 = vrcp.f32 %v572_v22 }
 0x383   :  { %v370_v15 = vpop.xlane.xlu0 %369  ;;  %1259 = vrcp.f32 %v385_v12 }
 0x384   :  { %v1254_v0 = vpop.eup %1253  ;;  %v386_v42 = vmax.f32 %v370_v15, 1e-30 }
 0x385   :  { %v891_v46 = vmul.f32 %v1254_v0, %v1825_v31  ;;  %v1256_v28 = vpop.eup %1255  ;;  %v573_v31 = vmax.f32 %v559_v41, 1e-30 }
 0x386   :  { %1261 = vrcp.f32 %v386_v42  ;;  %v587_v43 = vmul.f32 %v1256_v28, %v1785_v48 }
 0x387   :  { %v373_v55 = vpop.xlane.xlu2 %372  ;;  %v898_v30 = vpack.c.bf16 %v892_v45, %v891_v46  ;;  %1263 = vrcp.f32 %v878_v32 }
 0x388   :  { %v1258_v19 = vpop.eup %1257  ;;  %v387_v48 = vmax.f32 %v373_v55, 1e-30 }
 0x389   :  { %1150 = vmatmul.msk.bf16.gmra.mxu3 %vm302_vm1, %v898_v30  ;;  %v588_v35 = vmul.f32 %v1258_v19, %v1833_v61  ;;  %v1260_v38 = vpop.eup %1259 }
 0x38a   :  { %v401_v26 = vmul.f32 %v1260_v38, %v1818_v25 }
 0x38b   :  { %v863_v57 = vpop.xlane.xlu0 %862  ;;  %v594_v56 = vpack.c.bf16 %v588_v35, %v587_v43  ;;  %v1179_v43 = vld [vmem:[%s1943_s3 + $0x8] sm:$0xff] }
 0x38c   :  { %v1262_v4 = vpop.eup %1261  ;;  %v877_v58 = vmax.f32 %v863_v57, 1e-30  ;;  %1010 = vmatpush.bf16.msra.mxu0 %v1179_v43 }
 0x38d   :  { %1130 = vmatmul.msk.bf16.gmra.mxu0 %vm302_vm1, %v594_v56  ;;  %v402_v49 = vmul.f32 %v1262_v4, %v1839_v2  ;;  %v1264_v5 = vpop.eup %1263 }
 0x38e   :  { %1265 = vrcp.f32 %v877_v58  ;;  %v894_v25 = vmul.f32 %v1264_v5, %v1795_v50 }
 0x38f   :  { %v562_v62 = vpop.xlane.xlu2 %561  ;;  %v408_v3 = vpack.c.bf16 %v402_v49, %v401_v26  ;;  %1267 = vrcp.f32 %v573_v31 }
 0x390   :  { %v574_v61 = vmax.f32 %v562_v62, 1e-30 }
 0x391   :  { %1134 = vmatmul.msk.bf16.gmra.mxu1 %vm302_vm1, %v408_v3 }
 0x392   :  { %1269 = vrcp.f32 %v574_v61 }
 0x393   :  { %v376_v6 = vpop.xlane.xlu0 %375  ;;  %1271 = vrcp.f32 %v387_v48 }
 0x394   :  { %v1266_v27 = vpop.eup %1265  ;;  %v388_v7 = vmax.f32 %v376_v6, 1e-30 }
 0x395   :  { %v893_v47 = vmul.f32 %v1266_v27, %v1850_v51  ;;  %v1268_v2 = vpop.eup %1267  ;;  %v575_v51 = vmax.f32 %v565_v39, 1e-30 }
 0x396   :  { %1273 = vrcp.f32 %v388_v7  ;;  %v589_v21 = vmul.f32 %v1268_v2, %v1799_v59 }
 0x397   :  { %v379_v11 = vpop.xlane.xlu2 %378  ;;  %v899_v13 = vpack.c.bf16 %v894_v25, %v893_v47  ;;  %1275 = vrcp.f32 %v880_v1 }
 0x398   :  { %v1270_v53 = vpop.eup %1269  ;;  %v389_v59 = vmax.f32 %v379_v11, 1e-30 }
 0x399   :  { %1151 = vmatmul.msk.bf16.gmra.mxu3 %vm302_vm1, %v899_v13  ;;  %v590_v29 = vmul.f32 %v1270_v53, %v1856_v20  ;;  %v1272_v14 = vpop.eup %1271 }
 0x39a   :  { %v403_v9 = vmul.f32 %v1272_v14, %v1845_v10 }
 0x39b   :  { %v869_v17 = vpop.xlane.xlu0 %868  ;;  %v595_v37 = vpack.c.bf16 %v590_v29, %v589_v21 }
 0x39c   :  { %v1274_v16 = vpop.eup %1273  ;;  %v879_v50 = vmax.f32 %v869_v17, 1e-30 }
 0x39d   :  { %1131 = vmatmul.msk.bf16.gmra.mxu0 %vm302_vm1, %v595_v37  ;;  %v404_v44 = vmul.f32 %v1274_v16, %v1862_v54  ;;  %v1276_v20 = vpop.eup %1275  ;;  %v968_v37 = vld [vmem:[%s1944_s4] sm:$0x3f]  ;;  %s1349_s4 = smov [#allocation5]  }
 0x39e   :  { %1277 = vrcp.f32 %v879_v50  ;;  %v896_v10 = vmul.f32 %v1276_v20, %v1809_v18  ;;  %v987_v43 = vperm.slane %v968_v37, 3  ;;  %s1034_s28 = sshll.u32 %s1349_s4, 4  ;;  %s1035_s28 = int_to_ptr.vmem [resolvable:$true] %s1034_s28 }
 0x39f   :  { %v568_v36 = vpop.xlane.xlu2 %567  ;;  %v409_v12 = vpack.c.bf16 %v404_v44, %v403_v9  ;;  %1279 = vrcp.f32 %v575_v51 }
 0x3a0   :  { %v576_v22 = vmax.f32 %v568_v36, 1e-30 }
 0x3a1   :  { %1135 = vmatmul.msk.bf16.gmra.mxu1 %vm302_vm1, %v409_v12  ;;  %v971_v12 = vperm.slane %v968_v37, 0 }
 0x3a2   :  { %1281 = vrcp.f32 %v576_v22 }
 0x3a3   :  { %v382_v8 = vpop.xlane.xlu0 %381  ;;  %1283 = vrcp.f32 %v389_v59 }
 0x3a4   :  { %v1278_v15 = vpop.eup %1277  ;;  %v390_v0 = vmax.f32 %v382_v8, 1e-30 }
 0x3a5   :  { %v895_v42 = vmul.f32 %v1278_v15, %v1874_v40  ;;  %v1280_v41 = vpop.eup %1279 }
 0x3a6   :  { %1285 = vrcp.f32 %v390_v0  ;;  %v591_v45 = vmul.f32 %v1280_v41, %v1814_v24  ;;  %v642_v24 = vpop.f32.mrf.mxu0 }
 0x3a7   :  { %v900_v54 = vpack.c.bf16 %v896_v10, %v895_v42 }
 0x3a8   :  { %v1282_v46 = vpop.eup %1281 }
 0x3a9   :  { %1152 = vmatmul.msk.bf16.gmra.mxu3 %vm302_vm1, %v900_v54  ;;  %v592_v28 = vmul.f32 %v1282_v46, %v1878_v33  ;;  %v1284_v55 = vpop.eup %1283  ;;  %v976_v46 = vperm.slane %v968_v37, 1 }
 0x3aa   :  { %v405_v32 = vmul.f32 %v1284_v55, %v1869_v23  ;;  %v1178_v23 = vld [vmem:[%s1943_s3] sm:$0xff] }
 0x3ab   :  { %v596_v30 = vpack.c.bf16 %v592_v28, %v591_v45  ;;  %1011 = vmatpush.bf16.msra.mxu0 %v1178_v23 }
 0x3ac   :  { %v1286_v19 = vpop.eup %1285 }
 0x3ad   :  { %1132 = vmatmul.msk.bf16.gmra.mxu0 %vm302_vm1, %v596_v30  ;;  %v406_v40 = vmul.f32 %v1286_v19, %v1882_v34  ;;  %v979_v30 = vperm.slane %v968_v37, 2 }
 0x3ae   :  { %v644_v38 = vpop.f32.mrf.mxu0 }
 0x3af   :  { %v410_v18 = vpack.c.bf16 %v406_v40, %v405_v32 }
 0x3b1   :  { %1136 = vmatmul.msk.bf16.gmra.mxu1 %vm302_vm1, %v410_v18 }
 0x3bf   :  { %v695_v33 = vpop.f32.mrf.mxu1 }
 0x3c0   :  { %v696_v7 = vadd.f32 %v695_v33, %v642_v24 }
 0x3c7   :  { %v697_v56 = vpop.f32.mrf.mxu1 }
 0x3c8   :  { %v698_v16 = vadd.f32 %v697_v56, %v644_v38  ;;  %v1022_v38 = vperm.slane %v968_v37, 4  ;;  %v1025_v56 = vperm.slane %v968_v37, 5 }
 0x3d7   :  { %v934_v35 = vpop.f32.mrf.mxu3 }
 0x3d8   :  { %v954_v2 = vadd.f32 %v934_v35, %v696_v7 }
 0x3df   :  { %v936_v57 = vpop.f32.mrf.mxu3 }
 0x3e0   :  { %v955_v9 = vadd.f32 %v936_v57, %v698_v16 }
 0x40a   :  { %v647_v4 = vpop.f32.mrf.mxu0 }
 0x40c   :  { %v939_v34 = vpop.f32.mrf.mxu3 }
 0x40e   :  { %v700_v31 = vpop.f32.mrf.mxu1 }
 0x40f   :  { %v701_v6 = vadd.f32 %v700_v31, %v647_v4 }
 0x411   :  { %v956_v47 = vadd.f32 %v939_v34, %v701_v6 }
 0x412   :  { %v649_v58 = vpop.f32.mrf.mxu0 }
 0x413   :  { %v962_v1 = vadd.f32 %v956_v47, %v954_v2 }
 0x414   :  { %v941_v26 = vpop.f32.mrf.mxu3 }
 0x416   :  { %v702_v49 = vpop.f32.mrf.mxu1 }
 0x417   :  { %v703_v39 = vadd.f32 %v702_v49, %v649_v58 }
 0x419   :  { %v957_v51 = vadd.f32 %v941_v26, %v703_v39 }
 0x41a   :  { %v652_v52 = vpop.f32.mrf.mxu0 }
 0x41b   :  { %v963_v20 = vadd.f32 %v957_v51, %v955_v9 }
 0x41c   :  { %v944_v62 = vpop.f32.mrf.mxu3 }
 0x41e   :  { %v705_v3 = vpop.f32.mrf.mxu1 }
 0x41f   :  { %v706_v27 = vadd.f32 %v705_v3, %v652_v52 }
 0x421   :  { %v958_v11 = vadd.f32 %v944_v62, %v706_v27 }
 0x422   :  { %v654_v48 = vpop.f32.mrf.mxu0 }
 0x423   :  { %v964_v29 = vadd.f32 %v962_v1, %v958_v11 }
 0x424   :  { %v946_v61 = vpop.f32.mrf.mxu3 }
 0x426   :  { %v707_v5 = vpop.f32.mrf.mxu1 }
 0x427   :  { %v708_v14 = vadd.f32 %v707_v5, %v654_v48 }
 0x429   :  { %v959_v44 = vadd.f32 %v946_v61, %v708_v14 }
 0x42a   :  { %v657_v25 = vpop.f32.mrf.mxu0 }
 0x42b   :  { %v965_v0 = vadd.f32 %v963_v20, %v959_v44 }
 0x42c   :  { %v949_v13 = vpop.f32.mrf.mxu3 }
 0x42e   :  { %v710_v53 = vpop.f32.mrf.mxu1 }
 0x42f   :  { %v711_v21 = vadd.f32 %v710_v53, %v657_v25 }
 0x431   :  { %v960_v17 = vadd.f32 %v949_v13, %v711_v21 }
 0x432   :  { %v659_v59 = vpop.f32.mrf.mxu0 }
 0x433   :  { %v966_v50 = vadd.f32 %v964_v29, %v960_v17 }
 0x434   :  { %v951_v15 = vpop.f32.mrf.mxu3 }
 0x435   :  { %v969_v36 = vadd.f32 %v966_v50, %v1482_v60 }
 0x436   :  { %v712_v22 = vpop.f32.mrf.mxu1 }
 0x437   :  { %v713_v8 = vadd.f32 %v712_v22, %v659_v59  ;;  %v972_v42 = vadd.f32 %v971_v12, %v969_v36 }
 0x439   :  { %v961_v10 = vadd.f32 %v951_v15, %v713_v8  ;;  %v974_v54 = vmax.f32 %v972_v42, 0.0 }
 0x43b   :  { %v967_v41 = vadd.f32 %v965_v0, %v961_v10  ;;  %v977_v55 = vmul.f32 %v976_v46, %v974_v54 }
 0x43d   :  { %v970_v45 = vadd.f32 %v967_v41, %v1485_v63  ;;  %v980_v60 = vadd.f32 %v979_v30, %v977_v55 }
 0x43f   :  { %v973_v28 = vadd.f32 %v971_v12, %v970_v45 }
 0x441   :  { %v975_v19 = vmax.f32 %v973_v28, 0.0 }
 0x443   :  { %v978_v32 = vmul.f32 %v976_v46, %v975_v19 }
 0x445   :  { %v981_v40 = vadd.f32 %v979_v30, %v978_v32 }
 0x447   :  { %v982_v18 = vpack.c.bf16 %v981_v40, %v980_v60 }
 0x449   :  { %1161 = vmatmul.msk.bf16.vlgmr.msra.gmra.mxu0 %vm1000_vm2, %v982_v18 }
 0x4c6   :  { %v1013_v24 = vpop.f32.mrf.mxu0 }
 0x4c7   :  { %v1014_v35 = vadd.f32 %v1013_v24, %v987_v43 }
 0x4c9   :  { %v1018_v33 = vmax.f32 %v1014_v35, 0.0 }
 0x4cb   :  { %v1020_v57 = vadd.f32 %v1018_v33, %v980_v60 }
 0x4cd   :  { %v1023_v4 = vmul.f32 %v1022_v38, %v1020_v57 }
 0x4ce   :  { %v1015_v63 = vpop.f32.mrf.mxu0 }
 0x4cf   :  { %v1026_v23 = vadd.f32 %v1025_v56, %v1023_v4  ;;  %v1016_v34 = vadd.f32 %v1015_v63, %v987_v43 }
 0x4d1   :  { %1028 = vst.msk [vmem:[#allocation5] sm:$0xff] %vm1000_vm2, %v1026_v23  ;;  %v1019_v31 = vmax.f32 %v1016_v34, 0.0 }
 0x4d3   :  { %v1021_v58 = vadd.f32 %v1019_v31, %v981_v40 }
 0x4d5   :  { %v1024_v26 = vmul.f32 %v1022_v38, %v1021_v58 }
 0x4d7   :  { %v1027_v49 = vadd.f32 %v1025_v56, %v1024_v26 }
 0x4d9   :  { %1029 = vst.msk [vmem:[#allocation5 + $0x8] sm:$0xff] %vm1000_vm2, %v1027_v49 }
 0x4da   :  { %1042 = dma.vmem_to_hbm [thread:$0]  %s1035_s28, 256, %s1037_s30, [#allocation4], %s1340_s23, %s1340_s23, %s1341_s24  }
 0x4db   :  { %1337 = dma.done.wait [#allocation4], 256  }
 0x4dc   :  { %1338 = vsyncadd [#allocation4], 4294967040 }
 0x4dd   :  { %1047 = vsyncpa [#allocation3], 1 }
 0x4de   :  { %1048 = vsyncpa [#allocation4], 1 }

</bundles_post_ra>
